<compile_context>
chip_gen: v7x
topology: tpu7x:2x2x1
jax: 0.10.0
libtpu: 0.0.40
codegen_flags: <defaults>
</compile_context>

<pallas_src>
import functools

import jax
import jax.numpy as jnp
from jax.experimental import pallas as pl
from jax.experimental.pallas import tpu as pltpu

IN_DIM = 9 * 9 + 9   # 90
H1 = 128
H2 = 64
OUT_DIM = 1


def _round_up(a, m):
    return ((a + m - 1) // m) * m


def _splitbrain_kernel(x_ref, w1_ref, b1_ref, w2_ref, b2_ref, w3_ref, b3_ref, o_ref):
    # In-kernel bf16 cast of the streamed x tile (f32 in HBM/VMEM).
    x_b = x_ref[...].astype(jnp.bfloat16)                        # (TB, 90)

    # fc1 + relu : bf16 MXU matmul, f32 accumulate, f32 elementwise.
    h1 = jnp.dot(x_b, w1_ref[...], preferred_element_type=jnp.float32)
    h1 = jnp.maximum(h1 + b1_ref[...], 0.0)                      # (TB, 128) f32

    # fc2 + relu
    h2 = jnp.dot(h1.astype(jnp.bfloat16), w2_ref[...],
                 preferred_element_type=jnp.float32)
    h2 = jnp.maximum(h2 + b2_ref[...], 0.0)                      # (TB, 64) f32

    # fc3: contract the 64-feature axis of h2 against w3 so the batch tile ends
    # up on the lane axis -> lane-dense (1, TB) output.  w3_ref is (8, 64) with
    # the weight row replicated across sublanes (keeps M a multiple of 8).
    z = jax.lax.dot_general(
        w3_ref[...], h2.astype(jnp.bfloat16),
        dimension_numbers=(((1,), (1,)), ((), ())),
        preferred_element_type=jnp.float32)                      # (8, TB), rows identical
    z = z[0:1, :] + b3_ref[0, 0]                                 # (1, TB) + SMEM scalar
    o_ref[...] = jax.nn.sigmoid(z)


def prepare_params(params):
    """One-time parameter preprocessing (hoisted out of the forward path)."""
    w1, b1, w2, b2, w3, b3 = params
    return (
        w1.astype(jnp.bfloat16),                                  # (90, 128)
        b1.reshape(1, H1).astype(jnp.float32),                    # (1, 128)
        w2.astype(jnp.bfloat16),                                  # (128, 64)
        b2.reshape(1, H2).astype(jnp.float32),                    # (1, 64)
        jnp.broadcast_to(w3.reshape(1, H2), (8, H2)).astype(jnp.bfloat16),  # (8, 64)
        b3.reshape(1, 1).astype(jnp.float32),                     # (1, 1) SMEM scalar
    )


def splitbrain_forward(x, prepared, *, tile_b=4096):
    """x: (B, 90) f32, prepared = prepare_params(params) -> (B, 1) f32."""
    w1_b, b1_r, w2_b, b2_r, w3_b, b3_s = prepared
    B, d = x.shape
    assert d == IN_DIM
    assert tile_b % 128 == 0

    # Cap the tile at the 128-rounded batch so tiny batches don't waste work.
    tile_b = max(128, min(tile_b, _round_up(B, 128)))
    nb = pl.cdiv(B, tile_b)
    # v7x megacore: the "parallel" batch axis is sharded across 2 TensorCores;
    # prefer an even number of grid steps when we can get one.
    if nb > 1 and nb % 2 == 1:
        tile_b_even = _round_up(pl.cdiv(B, nb + 1), 128)
        if pl.cdiv(B, tile_b_even) == nb + 1:
            tile_b, nb = tile_b_even, nb + 1

    flops = 2 * B * (IN_DIM * H1 + H1 * H2 + H2 * OUT_DIM)
    bytes_accessed = int(
        x.size * x.dtype.itemsize
        + w1_b.size * 2 + w2_b.size * 2 + w3_b.size * 2
        + b1_r.size * 4 + b2_r.size * 4 + b3_s.size * 4
        + B * 4)

    out = pl.pallas_call(
        _splitbrain_kernel,
        out_shape=jax.ShapeDtypeStruct((1, B), jnp.float32),
        grid=(nb,),
        in_specs=[
            pl.BlockSpec((tile_b, IN_DIM), lambda i: (i, 0)),     # x tile (streamed, 2-buf)
            pl.BlockSpec((IN_DIM, H1), lambda i: (0, 0)),         # w1 (VMEM-resident)
            pl.BlockSpec((1, H1), lambda i: (0, 0)),              # b1
            pl.BlockSpec((H1, H2), lambda i: (0, 0)),             # w2
            pl.BlockSpec((1, H2), lambda i: (0, 0)),              # b2
            pl.BlockSpec((8, H2), lambda i: (0, 0)),              # w3 (replicated row)
            pl.BlockSpec(memory_space=pltpu.MemorySpace.SMEM),    # b3 scalar
        ],
        out_specs=pl.BlockSpec((1, tile_b), lambda i: (0, i)),    # lane-dense output row
        compiler_params=pltpu.CompilerParams(
            dimension_semantics=("parallel",),
            vmem_limit_bytes=48 * 1024 * 1024,
        ),
        cost_estimate=pl.CostEstimate(
            flops=flops, transcendentals=B, bytes_accessed=bytes_accessed),
    )(x, w1_b, b1_r, w2_b, b2_r, w3_b, b3_s)

    return out.reshape(B, OUT_DIM)


def init_params(key):
    """Deterministic parameter init (PyTorch-Linear-style uniform fan-in bound)."""
    ks = jax.random.split(key, 6)

    def linear(kw, kb, fan_in, fan_out):
        bound = 1.0 / jnp.sqrt(fan_in)
        w = jax.random.uniform(kw, (fan_in, fan_out), jnp.float32, -bound, bound)
        b = jax.random.uniform(kb, (1, fan_out), jnp.float32, -bound, bound)
        return w, b

    w1, b1 = linear(ks[0], ks[1], IN_DIM, H1)
    w2, b2 = linear(ks[2], ks[3], H1, H2)
    w3, b3 = linear(ks[4], ks[5], H2, OUT_DIM)
    return (w1, b1, w2, b2, w3, b3)


def reference_forward(x, params):
    w1, b1, w2, b2, w3, b3 = params
    h = jnp.maximum(x @ w1 + b1, 0.0)
    h = jnp.maximum(h @ w2 + b2, 0.0)
    return jax.nn.sigmoid(h @ w3 + b3)


if __name__ == "__main__":
    key = jax.random.PRNGKey(0)
    k_params, k_x = jax.random.split(key)

    params = init_params(k_params)
    prepared = prepare_params(params)

    fwd = jax.jit(functools.partial(splitbrain_forward), static_argnames=("tile_b",))

    # B=600: ragged batch (not a multiple of 128) -> exercises partial edge
    # blocks with no wrapper-side padding.
    B = 600
    x = jax.random.normal(k_x, (B, IN_DIM), dtype=jnp.float32)
    ref = reference_forward(x, params)

    # 1) Default (large) tile: single partial block.
    out = jax.block_until_ready(fwd(x, prepared))
    assert out.shape == (B, OUT_DIM)
    assert jnp.allclose(out, ref, atol=1e-2, rtol=1e-2), \
        float(jnp.max(jnp.abs(out - ref)))

    # 2) Small tile: multi-step grid (3 tiles of 256 rows, last one ragged),
    #    exercising the double-buffered x pipeline.
    out2 = jax.block_until_ready(fwd(x, prepared, tile_b=256))
    assert out2.shape == (B, OUT_DIM)
    assert jnp.allclose(out2, ref, atol=1e-2, rtol=1e-2), \
        float(jnp.max(jnp.abs(out2 - ref)))

    print("KERNEL_OK")
</pallas_src>

<mosaic_0001>
module attributes {stable_mosaic.version = 11 : i64} {
  func.func @_splitbrain_kernel(%arg0: i32, %arg1: memref<640x90xf32, #tpu.memory_space<vmem>>, %arg2: memref<90x128xbf16, #tpu.memory_space<vmem>>, %arg3: memref<1x128xf32, #tpu.memory_space<vmem>>, %arg4: memref<128x64xbf16, #tpu.memory_space<vmem>>, %arg5: memref<1x64xf32, #tpu.memory_space<vmem>>, %arg6: memref<8x64xbf16, #tpu.memory_space<vmem>>, %arg7: memref<1x1xf32, #tpu.memory_space<smem>>, %arg8: memref<1x640xf32, #tpu.memory_space<vmem>>) attributes {dimension_semantics = [#tpu.dimension_semantics<parallel>], iteration_bounds = array<i64: 1>, scalar_prefetch = 0 : i64, scratch_operands = 0 : i64, tpu.core_type = #tpu.core_type<tc>, window_params = [{transform_indices = @transform_0, window_bounds = array<i64: 640, 90>}, {pipeline_mode = #tpu.pipeline_mode<synchronous>, transform_indices = @transform_1, window_bounds = array<i64: 90, 128>}, {pipeline_mode = #tpu.pipeline_mode<synchronous>, transform_indices = @transform_2, window_bounds = array<i64: 1, 128>}, {pipeline_mode = #tpu.pipeline_mode<synchronous>, transform_indices = @transform_3, window_bounds = array<i64: 128, 64>}, {pipeline_mode = #tpu.pipeline_mode<synchronous>, transform_indices = @transform_4, window_bounds = array<i64: 1, 64>}, {pipeline_mode = #tpu.pipeline_mode<synchronous>, transform_indices = @transform_5, window_bounds = array<i64: 8, 64>}, {transform_indices = @transform_6, window_bounds = array<i64: 1, 1>}, {transform_indices = @transform_7, window_bounds = array<i64: 1, 640>}]} {
    %c0 = arith.constant 0 : index
    %c0_0 = arith.constant 0 : index
    %0 = vector.load %arg1[%c0, %c0_0] : memref<640x90xf32, #tpu.memory_space<vmem>>, vector<640x90xf32>
    %1 = arith.truncf %0 : vector<640x90xf32> to vector<640x90xbf16>
    %c0_1 = arith.constant 0 : index
    %c0_2 = arith.constant 0 : index
    %2 = vector.load %arg2[%c0_1, %c0_2] : memref<90x128xbf16, #tpu.memory_space<vmem>>, vector<90x128xbf16>
    %cst = arith.constant dense<0.000000e+00> : vector<640x128xf32>
    %3 = tpu.matmul %1, %2, %cst {dimension_numbers = #tpu.dot_dimension_numbers<[1], [0], [0], [1], [0, 0, 1, 1], [], []>} : vector<640x90xbf16>, vector<90x128xbf16>, vector<640x128xf32> -> vector<640x128xf32>
    %c0_3 = arith.constant 0 : index
    %c0_4 = arith.constant 0 : index
    %4 = vector.load %arg3[%c0_3, %c0_4] : memref<1x128xf32, #tpu.memory_space<vmem>>, vector<1x128xf32>
    %5 = vector.broadcast %4 : vector<1x128xf32> to vector<640x128xf32>
    %6 = arith.addf %3, %5 : vector<640x128xf32>
    %cst_5 = arith.constant 0.000000e+00 : f32
    %7 = vector.broadcast %cst_5 : f32 to vector<640x128xf32>
    %8 = arith.maximumf %6, %7 : vector<640x128xf32>
    %9 = arith.truncf %8 : vector<640x128xf32> to vector<640x128xbf16>
    %c0_6 = arith.constant 0 : index
    %c0_7 = arith.constant 0 : index
    %10 = vector.load %arg4[%c0_6, %c0_7] : memref<128x64xbf16, #tpu.memory_space<vmem>>, vector<128x64xbf16>
    %cst_8 = arith.constant dense<0.000000e+00> : vector<640x64xf32>
    %11 = tpu.matmul %9, %10, %cst_8 {dimension_numbers = #tpu.dot_dimension_numbers<[1], [0], [0], [1], [0, 0, 1, 1], [], []>} : vector<640x128xbf16>, vector<128x64xbf16>, vector<640x64xf32> -> vector<640x64xf32>
    %c0_9 = arith.constant 0 : index
    %c0_10 = arith.constant 0 : index
    %12 = vector.load %arg5[%c0_9, %c0_10] : memref<1x64xf32, #tpu.memory_space<vmem>>, vector<1x64xf32>
    %13 = vector.broadcast %12 : vector<1x64xf32> to vector<640x64xf32>
    %14 = arith.addf %11, %13 : vector<640x64xf32>
    %cst_11 = arith.constant 0.000000e+00 : f32
    %15 = vector.broadcast %cst_11 : f32 to vector<640x64xf32>
    %16 = arith.maximumf %14, %15 : vector<640x64xf32>
    %c0_12 = arith.constant 0 : index
    %c0_13 = arith.constant 0 : index
    %17 = vector.load %arg6[%c0_12, %c0_13] : memref<8x64xbf16, #tpu.memory_space<vmem>>, vector<8x64xbf16>
    %18 = arith.truncf %16 : vector<640x64xf32> to vector<640x64xbf16>
    %cst_14 = arith.constant dense<0.000000e+00> : vector<8x640xf32>
    %19 = tpu.matmul %17, %18, %cst_14 {dimension_numbers = #tpu.dot_dimension_numbers<[1], [1], [0], [0], [0, 0, 1, 0], [], []>} : vector<8x64xbf16>, vector<640x64xbf16>, vector<8x640xf32> -> vector<8x640xf32>
    %20 = vector.extract_strided_slice %19 {offsets = [0, 0], sizes = [1, 640], strides = [1, 1]} : vector<8x640xf32> to vector<1x640xf32>
    %c0_15 = arith.constant 0 : index
    %c0_16 = arith.constant 0 : index
    %21 = memref.load %arg7[%c0_15, %c0_16] : memref<1x1xf32, #tpu.memory_space<smem>>
    %22 = vector.broadcast %21 : f32 to vector<1x640xf32>
    %23 = arith.addf %20, %22 : vector<1x640xf32>
    %24 = arith.negf %23 : vector<1x640xf32>
    %25 = math.exp %24 : vector<1x640xf32>
    %cst_17 = arith.constant 1.000000e+00 : f32
    %26 = vector.broadcast %cst_17 : f32 to vector<1x640xf32>
    %27 = arith.addf %26, %25 : vector<1x640xf32>
    %28 = arith.divf %26, %27 : vector<1x640xf32>
    %c0_18 = arith.constant 0 : index
    %c0_19 = arith.constant 0 : index
    %29 = vector.load %arg8[%c0_18, %c0_19] : memref<1x640xf32, #tpu.memory_space<vmem>>, vector<1x640xf32>
    tpu.vector_store %arg8[%c0_18, %c0_19], %28 {strides = array<i32>} : memref<1x640xf32, #tpu.memory_space<vmem>>, vector<1x640xf32>,
    return
  }
  func.func @transform_0(%arg0: i32) -> (i32, i32) {
    %c0_i32 = arith.constant 0 : i32
    %c0_i32_0 = arith.constant 0 : i32
    return %arg0, %c0_i32 : i32, i32
  }
  func.func @transform_1(%arg0: i32) -> (i32, i32) {
    %c0_i32 = arith.constant 0 : i32
    %c0_i32_0 = arith.constant 0 : i32
    %c0_i32_1 = arith.constant 0 : i32
    return %c0_i32, %c0_i32_0 : i32, i32
  }
  func.func @transform_2(%arg0: i32) -> (i32, i32) {
    %c0_i32 = arith.constant 0 : i32
    %c0_i32_0 = arith.constant 0 : i32
    %c0_i32_1 = arith.constant 0 : i32
    return %c0_i32, %c0_i32_0 : i32, i32
  }
  func.func @transform_3(%arg0: i32) -> (i32, i32) {
    %c0_i32 = arith.constant 0 : i32
    %c0_i32_0 = arith.constant 0 : i32
    %c0_i32_1 = arith.constant 0 : i32
    return %c0_i32, %c0_i32_0 : i32, i32
  }
  func.func @transform_4(%arg0: i32) -> (i32, i32) {
    %c0_i32 = arith.constant 0 : i32
    %c0_i32_0 = arith.constant 0 : i32
    %c0_i32_1 = arith.constant 0 : i32
    return %c0_i32, %c0_i32_0 : i32, i32
  }
  func.func @transform_5(%arg0: i32) -> (i32, i32) {
    %c0_i32 = arith.constant 0 : i32
    %c0_i32_0 = arith.constant 0 : i32
    %c0_i32_1 = arith.constant 0 : i32
    return %c0_i32, %c0_i32_0 : i32, i32
  }
  func.func @transform_6(%arg0: i32) -> (i32, i32) {
    %c0_i32 = arith.constant 0 : i32
    %c0_i32_0 = arith.constant 0 : i32
    %c0_i32_1 = arith.constant 0 : i32
    return %c0_i32, %c0_i32_0 : i32, i32
  }
  func.func @transform_7(%arg0: i32) -> (i32, i32) {
    %c0_i32 = arith.constant 0 : i32
    %c0_i32_0 = arith.constant 0 : i32
    return %c0_i32, %arg0 : i32, i32
  }
}

</mosaic_0001>

<bundles_post_ra>
// kernel: splitbrain_forward.1
= control target key start
LH: loop header
LB: loop body
LE: loop exit
PB: predicated region body
PF: predicated region fallthrough
CT: control target
= control target key end

     0   :  { %vm203_vm0 = vcmask 736256   ;;  %vm324_vm1 = vcmask 1044480   ;;  %s2889_s0 = inlined_call_operand.vmem [shape: f32[600,90], index: 0, kind: input, shape index: {}]   ;;  %s2890_s1 = inlined_call_operand.vmem [shape: bf16[90,128], index: 1, kind: input, shape index: {}]   ;;  %s2891_s2 = inlined_call_operand.vmem [shape: f32[1,128], index: 2, kind: input, shape index: {}]   ;;  %s2892_s3 = inlined_call_operand.vmem [shape: bf16[128,64], index: 3, kind: input, shape index: {}]   ;;  %s2893_s4 = inlined_call_operand.vmem [shape: f32[1,64], index: 4, kind: input, shape index: {}]   ;;  %s2894_s5 = inlined_call_operand.vmem [shape: bf16[8,64], index: 5, kind: input, shape index: {}]   ;;  %s2895_s6 = inlined_call_operand.<no memory space> [shape: f32[1,1], index: 6, kind: input, shape index: {}]   ;;  %s2896_s7 = inlined_call_operand.hbm [shape: f32[1,600], index: 7, kind: output, shape index: {}]  }
   0x1   :  { %v2138_v0 = vld [vmem:[%s2890_s1] sm:$0xff]   ;;  %v2139_v1 = vld [vmem:[%s2890_s1 + $0x8] sm:$0xff]   ;;  %v2140_v2 = vld [vmem:[%s2890_s1 + $0x10] sm:$0xff]  }
   0x2   :  { %1896 = vmatprep.subr.bf16.mxu0 %v2138_v0  ;;  %2104 = vmatprep.subr.bf16.mxu1 %v2138_v0  ;;  %v29_v3 = vld [vmem:[%s2889_s0] sm:$0xff]  ;;  %v30_v4 = vld [vmem:[%s2889_s0 + $0x8] sm:$0xff]  ;;  %v2141_v6 = vld [vmem:[%s2890_s1 + $0x18] sm:$0xff]  }
   0x3   :  { %1897 = vmatpush3.bf16.msra.mxu0 %v2138_v0  ;;  %2110 = vmatpush3.bf16.msra.mxu1 %v2138_v0  ;;  %v109_v5 = vpack.c.bf16 %v30_v4, %v29_v3  ;;  %v2142_v7 = vld [vmem:[%s2890_s1 + $0x20] sm:$0xff]   ;;  %v2143_v8 = vld [vmem:[%s2890_s1 + $0x28] sm:$0x1f]   ;;  %v31_v9 = vld [vmem:[%s2889_s0 + $0x10] sm:$0xff] }
   0x4   :  { %1898 = vmatprep.subr.bf16.mxu0 %v2139_v1  ;;  %2105 = vmatprep.subr.bf16.mxu1 %v2139_v1  ;;  %v32_v10 = vld [vmem:[%s2889_s0 + $0x18] sm:$0xff]  ;;  %v326_v11 = vsel %vm324_vm1, %v2143_v8, 0  ;;  %v33_v12 = vld [vmem:[%s2889_s0 + $0x20] sm:$0xff]  ;;  %v34_v13 = vld [vmem:[%s2889_s0 + $0x28] sm:$0xff] }
   0x5   :  { %1908 = vmatprep.mubr.msk.bf16.mxu0 %vm203_vm0, %v109_v5  ;;  %v110_v14 = vpack.c.bf16 %v32_v10, %v31_v9  ;;  %v111_v15 = vpack.c.bf16 %v34_v13, %v33_v12  ;;  %v35_v16 = vld [vmem:[%s2889_s0 + $0x30] sm:$0xff]  ;;  %v36_v17 = vld [vmem:[%s2889_s0 + $0x38] sm:$0xff]  ;;  %v37_v18 = vld [vmem:[%s2889_s0 + $0x40] sm:$0xff] }
   0x6   :  { %v38_v19 = vld [vmem:[%s2889_s0 + $0x48] sm:$0xff]  ;;  %v93_v20 = vld [vmem:[%s2889_s0 + $0x200] sm:$0xff]  ;;  %v95_v23 = vld [vmem:[%s2889_s0 + $0x210] sm:$0xff]  ;;  %v112_v28 = vpack.c.bf16 %v36_v17, %v35_v16 }
   0x7   :  { %1899 = vmatpush3.bf16.msra.mxu0 %v2139_v1  ;;  %2111 = vmatpush3.bf16.msra.mxu1 %v2139_v1  ;;  %v94_v21 = vld [vmem:[%s2889_s0 + $0x208] sm:$0xff]  ;;  %v96_v24 = vld [vmem:[%s2889_s0 + $0x218] sm:$0xff]  ;;  %v97_v25 = vld [vmem:[%s2889_s0 + $0x220] sm:$0xff]  ;;  %v113_v30 = vpack.c.bf16 %v38_v19, %v37_v18 }
   0x8   :  { %1900 = vmatprep.subr.bf16.mxu0 %v2140_v2  ;;  %2106 = vmatprep.subr.bf16.mxu1 %v2140_v2  ;;  %v141_v22 = vpack.c.bf16 %v94_v21, %v93_v20  ;;  %v142_v26 = vpack.c.bf16 %v96_v24, %v95_v23  ;;  %v98_v27 = vld [vmem:[%s2889_s0 + $0x228] sm:$0xff]  ;;  %v99_v31 = vld [vmem:[%s2889_s0 + $0x230] sm:$0xff]  ;;  %v100_v32 = vld [vmem:[%s2889_s0 + $0x238] sm:$0xff] }
   0x9   :  { %v143_v29 = vpack.c.bf16 %v98_v27, %v97_v25  ;;  %v101_v33 = vld [vmem:[%s2889_s0 + $0x240] sm:$0xff]  ;;  %v102_v34 = vld [vmem:[%s2889_s0 + $0x248] sm:$0xff]  ;;  %v39_v35 = vld [vmem:[%s2889_s0 + $0x50] sm:$0xff]  ;;  %v144_v40 = vpack.c.bf16 %v100_v32, %v99_v31 }
   0xa   :  { %1972 = vmatprep.mubr.msk.bf16.mxu1 %vm203_vm0, %v141_v22  ;;  %v40_v36 = vld [vmem:[%s2889_s0 + $0x58] sm:$0xff]  ;;  %v2144_v37 = vld [vmem:[%s2892_s3] sm:$0xff]   ;;  %v2145_v38 = vld [vmem:[%s2892_s3 + $0x8] sm:$0xff]   ;;  %v145_v42 = vpack.c.bf16 %v102_v34, %v101_v33 }
   0xb   :  { %1901 = vmatpush3.bf16.msra.mxu0 %v2140_v2  ;;  %2112 = vmatpush3.bf16.msra.mxu1 %v2140_v2  ;;  %v41_v39 = vld [vmem:[%s2889_s0 + $0x60] sm:$0xff]  ;;  %v42_v41 = vld [vmem:[%s2889_s0 + $0x68] sm:$0xff]  ;;  %v2146_v43 = vld [vmem:[%s2892_s3 + $0x10] sm:$0xff]   ;;  %v114_v44 = vpack.c.bf16 %v40_v36, %v39_v35 }
   0xc   :  { %1902 = vmatprep.subr.bf16.mxu0 %v2141_v6  ;;  %2107 = vmatprep.subr.bf16.mxu1 %v2141_v6  ;;  %v115_v45 = vpack.c.bf16 %v42_v41, %v41_v39  ;;  %v103_v46 = vld [vmem:[%s2889_s0 + $0x250] sm:$0xff]  ;;  %v104_v47 = vld [vmem:[%s2889_s0 + $0x258] sm:$0xff] }
   0xf   :  { %1903 = vmatpush3.bf16.msra.mxu0 %v2141_v6  ;;  %2113 = vmatpush3.bf16.msra.mxu1 %v2141_v6 }
  0x10   :  { %1904 = vmatprep.subr.bf16.mxu0 %v2142_v7  ;;  %2108 = vmatprep.subr.bf16.mxu1 %v2142_v7 }
  0x13   :  { %1905 = vmatpush3.bf16.msra.mxu0 %v2142_v7  ;;  %2114 = vmatpush3.bf16.msra.mxu1 %v2142_v7 }
  0x14   :  { %2116 = vmatprep.subr.msk.bf16.mxu0 %vm324_vm1, %v2143_v8  ;;  %2117 = vmatprep.subr.msk.bf16.mxu1 %vm324_vm1, %v2143_v8 }
  0x17   :  { %1907 = vmatpush3.bf16.msra.mxu0 %v326_v11  ;;  %2115 = vmatpush3.bf16.msra.mxu1 %v326_v11 }
  0x18   :  { %1988 = vmatprep.subr.bf16.mxu1 %v2144_v37 }
  0x1a   :  { %1909 = vmatmul.mubr.msk.bf16.vlgmr.msra.gmra.mrb[0].mxu0 %vm203_vm0, %v110_v14  ;;  %1973 = vmatmul.mubr.msk.bf16.vlgmr.msra.gmra.mrb[0].mxu1 %vm203_vm0, %v142_v26 }
  0x1b   :  { %1912 = vmatprep.mubr.msk.bf16.mxu0 %vm203_vm0, %v111_v15  ;;  %1976 = vmatprep.mubr.msk.bf16.mxu1 %vm203_vm0, %v143_v29 }
  0x1c   :  { %1989 = vmatpush3.bf16.msra.mxu1 %v2144_v37 }
  0x1d   :  { %1990 = vmatprep.subr.bf16.mxu1 %v2145_v38 }
  0x20   :  { %1991 = vmatpush3.bf16.msra.mxu1 %v2145_v38 }
  0x22   :  { %1913 = vmatmul.mubr.msk.bf16.gmra.mrb[4].mxu0 %vm203_vm0, %v112_v28  ;;  %1977 = vmatmul.mubr.msk.bf16.gmra.mrb[4].mxu1 %vm203_vm0, %v144_v40 }
  0x23   :  { %1916 = vmatprep.mubr.msk.bf16.mxu0 %vm203_vm0, %v113_v30  ;;  %1980 = vmatprep.mubr.msk.bf16.mxu1 %vm203_vm0, %v145_v42 }
  0x24   :  { %13 = vsyncpa [#allocation4], 0  ;;  %v105_v48 = vld [vmem:[%s2889_s0 + $0x260] sm:$0xff]  ;;  %v106_v49 = vld [vmem:[%s2889_s0 + $0x268] sm:$0xff]  ;;  %1992 = vmatprep.subr.bf16.mxu1 %v2146_v43  ;;  %v146_v53 = vpack.c.bf16 %v104_v47, %v103_v46  ;;  %vm1346_vm2 = vcmask 523264   ;;  %vm2197_vm3 = vmmov 0  }
  0x25   :  { %v2147_v50 = vld [vmem:[%s2892_s3 + $0x18] sm:$0xff]   ;;  %v43_v51 = vld [vmem:[%s2889_s0 + $0x70] sm:$0xff]  ;;  %v45_v54 = vld [vmem:[%s2889_s0 + $0x80] sm:$0xff]  ;;  %v147_v56 = vpack.c.bf16 %v106_v49, %v105_v48  ;;  %1993 = vmatpush3.bf16.msra.mxu1 %v2146_v43 }
  0x26   :  { %v44_v52 = vld [vmem:[%s2889_s0 + $0x78] sm:$0xff]  ;;  %v46_v55 = vld [vmem:[%s2889_s0 + $0x88] sm:$0xff]  ;;  %1994 = vmatprep.subr.bf16.mxu1 %v2147_v50  ;;  %v2148_v57 = vld [vmem:[%s2892_s3 + $0x20] sm:$0xff]  }
  0x27   :  { %v116_v58 = vpack.c.bf16 %v44_v52, %v43_v51  ;;  %v117_v59 = vpack.c.bf16 %v46_v55, %v45_v54  ;;  %v107_v60 = vld [vmem:[%s2889_s0 + $0x270] sm:$0xff]  ;;  %v108_v61 = vld [vmem:[%s2889_s0 + $0x278] sm:$0xff]  ;;  %v2149_v62 = vld [vmem:[%s2892_s3 + $0x28] sm:$0xff]  }
  0x28   :  { %v47_v63 = vld [vmem:[%s2889_s0 + $0x90] sm:$0xff]  ;;  %v48_v0 = vld [vmem:[%s2889_s0 + $0x98] sm:$0xff]  ;;  %v148_v1 = vpack.c.bf16 %v108_v61, %v107_v60  ;;  %v49_v2 = vld [vmem:[%s2889_s0 + $0xa0] sm:$0xff] }
  0x29   :  { %1995 = vmatpush3.bf16.msra.mxu1 %v2147_v50  ;;  %v50_v3 = vld [vmem:[%s2889_s0 + $0xa8] sm:$0xff]  ;;  %v118_v4 = vpack.c.bf16 %v48_v0, %v47_v63  ;;  %v51_v6 = vld [vmem:[%s2889_s0 + $0xb0] sm:$0xff]  ;;  %v52_v7 = vld [vmem:[%s2889_s0 + $0xb8] sm:$0xff] }
  0x2a   :  { %1917 = vmatmul.mubr.msk.bf16.gmra.mrb[8].mxu0 %vm203_vm0, %v114_v44  ;;  %1981 = vmatmul.mubr.msk.bf16.gmra.mrb[8].mxu1 %vm203_vm0, %v146_v53  ;;  %v119_v5 = vpack.c.bf16 %v50_v3, %v49_v2  ;;  %v53_v8 = vld [vmem:[%s2889_s0 + $0xc0] sm:$0xff]  ;;  %v54_v9 = vld [vmem:[%s2889_s0 + $0xc8] sm:$0xff]  ;;  %v120_v10 = vpack.c.bf16 %v52_v7, %v51_v6  ;;  %v55_v12 = vld [vmem:[%s2889_s0 + $0xd0] sm:$0xff] }
  0x2b   :  { %1920 = vmatprep.mubr.msk.bf16.mxu0 %vm203_vm0, %v115_v45  ;;  %1984 = vmatprep.mubr.msk.bf16.mxu1 %vm203_vm0, %v147_v56  ;;  %v121_v11 = vpack.c.bf16 %v54_v9, %v53_v8  ;;  %v56_v13 = vld [vmem:[%s2889_s0 + $0xd8] sm:$0xff]  ;;  %v57_v14 = vld [vmem:[%s2889_s0 + $0xe0] sm:$0xff]  ;;  %v58_v15 = vld [vmem:[%s2889_s0 + $0xe8] sm:$0xff] }
  0x2c   :  { %1996 = vmatprep.subr.bf16.mxu1 %v2148_v57  ;;  %v122_v16 = vpack.c.bf16 %v56_v13, %v55_v12  ;;  %v123_v17 = vpack.c.bf16 %v58_v15, %v57_v14  ;;  %v59_v18 = vld [vmem:[%s2889_s0 + $0xf0] sm:$0xff]  ;;  %v60_v19 = vld [vmem:[%s2889_s0 + $0xf8] sm:$0xff]  ;;  %v61_v20 = vld [vmem:[%s2889_s0 + $0x100] sm:$0xff] }
  0x2d   :  { %1997 = vmatpush3.bf16.msra.mxu1 %v2148_v57  ;;  %v62_v21 = vld [vmem:[%s2889_s0 + $0x108] sm:$0xff]  ;;  %v124_v22 = vpack.c.bf16 %v60_v19, %v59_v18  ;;  %v63_v24 = vld [vmem:[%s2889_s0 + $0x110] sm:$0xff]  ;;  %v64_v25 = vld [vmem:[%s2889_s0 + $0x118] sm:$0xff] }
  0x2e   :  { %1998 = vmatprep.subr.bf16.mxu1 %v2149_v62  ;;  %v125_v23 = vpack.c.bf16 %v62_v21, %v61_v20  ;;  %v65_v26 = vld [vmem:[%s2889_s0 + $0x120] sm:$0xff]  ;;  %v66_v27 = vld [vmem:[%s2889_s0 + $0x128] sm:$0xff]  ;;  %v126_v28 = vpack.c.bf16 %v64_v25, %v63_v24  ;;  %v67_v30 = vld [vmem:[%s2889_s0 + $0x130] sm:$0xff] }
  0x2f   :  { %v127_v29 = vpack.c.bf16 %v66_v27, %v65_v26  ;;  %v68_v31 = vld [vmem:[%s2889_s0 + $0x138] sm:$0xff]  ;;  %v69_v32 = vld [vmem:[%s2889_s0 + $0x140] sm:$0xff]  ;;  %v70_v33 = vld [vmem:[%s2889_s0 + $0x148] sm:$0xff] }
  0x30   :  { %v128_v34 = vpack.c.bf16 %v68_v31, %v67_v30  ;;  %v129_v35 = vpack.c.bf16 %v70_v33, %v69_v32  ;;  %v71_v36 = vld [vmem:[%s2889_s0 + $0x150] sm:$0xff]  ;;  %v72_v37 = vld [vmem:[%s2889_s0 + $0x158] sm:$0xff]  ;;  %v73_v38 = vld [vmem:[%s2889_s0 + $0x160] sm:$0xff] }
  0x31   :  { %1999 = vmatpush3.bf16.msra.mxu1 %v2149_v62  ;;  %v74_v39 = vld [vmem:[%s2889_s0 + $0x168] sm:$0xff]  ;;  %v130_v40 = vpack.c.bf16 %v72_v37, %v71_v36  ;;  %v75_v42 = vld [vmem:[%s2889_s0 + $0x170] sm:$0xff]  ;;  %v76_v43 = vld [vmem:[%s2889_s0 + $0x178] sm:$0xff] }
  0x32   :  { %1921 = vmatmul.mubr.msk.bf16.gmra.mrb[12].mxu0 %vm203_vm0, %v116_v58  ;;  %1985 = vmatmul.mubr.msk.bf16.gmra.mrb[12].mxu1 %vm203_vm0, %v148_v1  ;;  %v131_v41 = vpack.c.bf16 %v74_v39, %v73_v38  ;;  %v77_v44 = vld [vmem:[%s2889_s0 + $0x180] sm:$0xff]  ;;  %v78_v45 = vld [vmem:[%s2889_s0 + $0x188] sm:$0xff]  ;;  %v132_v46 = vpack.c.bf16 %v76_v43, %v75_v42  ;;  %v2150_v47 = vld [vmem:[%s2892_s3 + $0x30] sm:$0xff]  }
  0x33   :  { %1924 = vmatprep.mubr.msk.bf16.mxu0 %vm203_vm0, %v117_v59  ;;  %v133_v48 = vpack.c.bf16 %v78_v45, %v77_v44  ;;  %2000 = vmatprep.subr.bf16.mxu1 %v2150_v47  ;;  %v2151_v49 = vld [vmem:[%s2892_s3 + $0x38] sm:$0xff]   ;;  %v79_v50 = vld [vmem:[%s2889_s0 + $0x190] sm:$0xff]  ;;  %v81_v52 = vld [vmem:[%s2889_s0 + $0x1a0] sm:$0xff] }
  0x34   :  { %v80_v51 = vld [vmem:[%s2889_s0 + $0x198] sm:$0xff]  ;;  %v82_v53 = vld [vmem:[%s2889_s0 + $0x1a8] sm:$0xff]  ;;  %v83_v56 = vld [vmem:[%s2889_s0 + $0x1b0] sm:$0xff] }
  0x35   :  { %2001 = vmatpush3.bf16.msra.mxu1 %v2150_v47  ;;  %v134_v54 = vpack.c.bf16 %v80_v51, %v79_v50  ;;  %v135_v55 = vpack.c.bf16 %v82_v53, %v81_v52  ;;  %v84_v57 = vld [vmem:[%s2889_s0 + $0x1b8] sm:$0xff]  ;;  %v85_v58 = vld [vmem:[%s2889_s0 + $0x1c0] sm:$0xff]  ;;  %v86_v59 = vld [vmem:[%s2889_s0 + $0x1c8] sm:$0xff] }
  0x36   :  { %2002 = vmatprep.subr.bf16.mxu1 %v2151_v49  ;;  %v136_v60 = vpack.c.bf16 %v84_v57, %v83_v56  ;;  %v137_v61 = vpack.c.bf16 %v86_v59, %v85_v58  ;;  %v87_v62 = vld [vmem:[%s2889_s0 + $0x1d0] sm:$0xff]  ;;  %v88_v63 = vld [vmem:[%s2889_s0 + $0x1d8] sm:$0xff]  ;;  %v89_v0 = vld [vmem:[%s2889_s0 + $0x1e0] sm:$0xff] }
  0x37   :  { %v90_v1 = vld [vmem:[%s2889_s0 + $0x1e8] sm:$0xff]  ;;  %v138_v2 = vpack.c.bf16 %v88_v63, %v87_v62  ;;  %v2565_v7 = vld [vmem:[%s2891_s2] ss:$0 sm:$0xff] }
  0x38   :  { %v139_v3 = vpack.c.bf16 %v90_v1, %v89_v0 }
  0x39   :  { %2003 = vmatpush3.bf16.msra.mxu1 %v2151_v49 }
  0x3a   :  { %1925 = vmatmul.mubr.msk.bf16.gmra.mrb[16].mxu0 %vm203_vm0, %v118_v4  ;;  %v91_v4 = vld [vmem:[%s2889_s0 + $0x1f0] sm:$0xff] }
  0x3b   :  { %1928 = vmatprep.mubr.msk.bf16.mxu0 %vm203_vm0, %v119_v5  ;;  %v92_v5 = vld [vmem:[%s2889_s0 + $0x1f8] sm:$0xff] }
  0x3c   :  { %v140_v6 = vpack.c.bf16 %v92_v5, %v91_v4 }
  0x42   :  { %1929 = vmatmul.mubr.msk.bf16.gmra.mrb[20].mxu0 %vm203_vm0, %v120_v10 }
  0x43   :  { %1932 = vmatprep.mubr.msk.bf16.mxu0 %vm203_vm0, %v121_v11 }
  0x4a   :  { %1933 = vmatmul.mubr.msk.bf16.gmra.mrb[24].mxu0 %vm203_vm0, %v122_v16 }
  0x4b   :  { %1936 = vmatprep.mubr.msk.bf16.mxu0 %vm203_vm0, %v123_v17 }
  0x52   :  { %1937 = vmatmul.mubr.msk.bf16.gmra.mrb[28].mxu0 %vm203_vm0, %v124_v22 }
  0x53   :  { %1940 = vmatprep.mubr.msk.bf16.mxu0 %vm203_vm0, %v125_v23 }
  0x5a   :  { %1941 = vmatmul.mubr.msk.bf16.gmra.mrb[32].mxu0 %vm203_vm0, %v126_v28 }
  0x5b   :  { %1944 = vmatprep.mubr.msk.bf16.mxu0 %vm203_vm0, %v127_v29 }
  0x62   :  { %1945 = vmatmul.mubr.msk.bf16.gmra.mrb[36].mxu0 %vm203_vm0, %v128_v34 }
  0x63   :  { %1948 = vmatprep.mubr.msk.bf16.mxu0 %vm203_vm0, %v129_v35 }
  0x6a   :  { %1949 = vmatmul.mubr.msk.bf16.gmra.mrb[40].mxu0 %vm203_vm0, %v130_v40 }
  0x6b   :  { %1952 = vmatprep.mubr.msk.bf16.mxu0 %vm203_vm0, %v131_v41 }
  0x72   :  { %1953 = vmatmul.mubr.msk.bf16.gmra.mrb[44].mxu0 %vm203_vm0, %v132_v46 }
  0x73   :  { %1956 = vmatprep.mubr.msk.bf16.mxu0 %vm203_vm0, %v133_v48 }
  0x7a   :  { %1957 = vmatmul.mubr.msk.bf16.gmra.mrb[48].mxu0 %vm203_vm0, %v134_v54 }
  0x7b   :  { %1960 = vmatprep.mubr.msk.bf16.mxu0 %vm203_vm0, %v135_v55 }
  0x82   :  { %1961 = vmatmul.mubr.msk.bf16.gmra.mrb[52].mxu0 %vm203_vm0, %v136_v60 }
  0x83   :  { %1964 = vmatprep.mubr.msk.bf16.mxu0 %vm203_vm0, %v137_v61 }
  0x8a   :  { %1965 = vmatmul.mubr.msk.bf16.gmra.mrb[56].mxu0 %vm203_vm0, %v138_v2 }
  0x8b   :  { %1968 = vmatprep.mubr.msk.bf16.mxu0 %vm203_vm0, %v139_v3 }
  0x92   :  { %1969 = vmatmul.mubr.msk.bf16.gmra.mrb[60].mxu0 %vm203_vm0, %v140_v6 }
  0xed   :  { %v1910_v8 = vpop.f32.mrb[0].mxu0  ;;  %v1974_v18 = vpop.f32.mrb[0].mxu1 }
  0xee   :  { %v371_v9 = vadd.f32 %v1910_v8, %v2565_v7  ;;  %v362_v10 = vpop.f32.mrb[1].mxu0  ;;  %v627_v21 = vadd.f32 %v1974_v18, %v2565_v7  ;;  %v618_v22 = vpop.f32.mrb[1].mxu1 }
  0xef   :  { %v363_v11 = vadd.f32 %v2565_v7, %v362_v10  ;;  %v1911_v12 = vpop.f32.mrb[2].mxu0  ;;  %v619_v24 = vadd.f32 %v2565_v7, %v618_v22  ;;  %v1975_v25 = vpop.f32.mrb[2].mxu1 }
  0xf0   :  { %v374_v13 = vadd.f32 %v1911_v12, %v2565_v7  ;;  %v365_v14 = vpop.f32.mrb[3].mxu0  ;;  %v683_v16 = vmax.f32 %v371_v9, 0.0  ;;  %v747_v28 = vmax.f32 %v627_v21, 0.0  ;;  %v630_v29 = vadd.f32 %v1975_v25, %v2565_v7  ;;  %v621_v30 = vpop.f32.mrb[3].mxu1 }
  0xf1   :  { %v366_v15 = vadd.f32 %v2565_v7, %v365_v14  ;;  %v681_v19 = vmax.f32 %v363_v11, 0.0  ;;  %v745_v33 = vmax.f32 %v619_v24, 0.0  ;;  %v622_v34 = vadd.f32 %v2565_v7, %v621_v30 }
  0xf2   :  { %v684_v17 = vmax.f32 %v374_v13, 0.0  ;;  %v748_v37 = vmax.f32 %v630_v29, 0.0 }
  0xf3   :  { %v682_v20 = vmax.f32 %v366_v15, 0.0  ;;  %v746_v40 = vmax.f32 %v622_v34, 0.0 }
  0xf4   :  { %v762_v23 = vpack.c.bf16 %v684_v17, %v683_v16  ;;  %v2579_v42 = vpack.c.bf16 %v748_v37, %v747_v28 }
  0xf5   :  { %v761_v26 = vpack.c.bf16 %v682_v20, %v681_v19  ;;  %v1914_v27 = vpop.f32.mrb[4].mxu0  ;;  %v2581_v45 = vpack.c.bf16 %v746_v40, %v745_v33  ;;  %v1978_v46 = vpop.f32.mrb[4].mxu1 }
  0xf6   :  { %v387_v31 = vadd.f32 %v1914_v27, %v2565_v7  ;;  %v378_v32 = vpop.f32.mrb[5].mxu0  ;;  %v643_v49 = vadd.f32 %v1978_v46, %v2565_v7  ;;  %v634_v50 = vpop.f32.mrb[5].mxu1 }
  0xf7   :  { %v379_v35 = vadd.f32 %v2565_v7, %v378_v32  ;;  %v1915_v36 = vpop.f32.mrb[6].mxu0  ;;  %2004 = vmatprep.mubr.bf16.mxu1 %v761_v26  ;;  %v635_v52 = vadd.f32 %v2565_v7, %v634_v50  ;;  %v1979_v53 = vpop.f32.mrb[6].mxu1 }
  0xf8   :  { %v390_v38 = vadd.f32 %v1915_v36, %v2565_v7  ;;  %v381_v39 = vpop.f32.mrb[7].mxu0  ;;  %2005 = vmatmul.mubr.bf16.vlgmr.msra.gmra.mrb[16].mxu1 %v762_v23  ;;  %v687_v43 = vmax.f32 %v387_v31, 0.0  ;;  %v751_v56 = vmax.f32 %v643_v49, 0.0  ;;  %v646_v57 = vadd.f32 %v1979_v53, %v2565_v7  ;;  %v637_v58 = vpop.f32.mrb[7].mxu1 }
  0xf9   :  { %v382_v41 = vadd.f32 %v2565_v7, %v381_v39  ;;  %v685_v47 = vmax.f32 %v379_v35, 0.0  ;;  %v749_v61 = vmax.f32 %v635_v52, 0.0  ;;  %v638_v62 = vadd.f32 %v2565_v7, %v637_v58 }
  0xfa   :  { %v688_v44 = vmax.f32 %v390_v38, 0.0  ;;  %v752_v1 = vmax.f32 %v646_v57, 0.0 }
  0xfb   :  { %v686_v48 = vmax.f32 %v382_v41, 0.0  ;;  %v750_v4 = vmax.f32 %v638_v62, 0.0 }
  0xfc   :  { %v764_v51 = vpack.c.bf16 %v688_v44, %v687_v43  ;;  %v2591_v6 = vpack.c.bf16 %v752_v1, %v751_v56 }
  0xfd   :  { %v763_v54 = vpack.c.bf16 %v686_v48, %v685_v47  ;;  %v1918_v55 = vpop.f32.mrb[8].mxu0  ;;  %v2593_v10 = vpack.c.bf16 %v750_v4, %v749_v61  ;;  %v1982_v11 = vpop.f32.mrb[8].mxu1 }
  0xfe   :  { %v403_v59 = vadd.f32 %v1918_v55, %v2565_v7  ;;  %v394_v60 = vpop.f32.mrb[9].mxu0  ;;  %v659_v14 = vadd.f32 %v1982_v11, %v2565_v7  ;;  %v650_v15 = vpop.f32.mrb[9].mxu1 }
  0xff   :  { %v395_v63 = vadd.f32 %v2565_v7, %v394_v60  ;;  %v1919_v0 = vpop.f32.mrb[10].mxu0  ;;  %2008 = vmatprep.mubr.bf16.mxu1 %v763_v54  ;;  %v651_v17 = vadd.f32 %v2565_v7, %v650_v15  ;;  %v1983_v18 = vpop.f32.mrb[10].mxu1 }
 0x100   :  { %v406_v2 = vadd.f32 %v1919_v0, %v2565_v7  ;;  %v397_v3 = vpop.f32.mrb[11].mxu0  ;;  %2009 = vmatmul.mubr.bf16.gmra.mrb[20].mxu1 %v764_v51  ;;  %v691_v8 = vmax.f32 %v403_v59, 0.0  ;;  %v755_v21 = vmax.f32 %v659_v14, 0.0  ;;  %v662_v22 = vadd.f32 %v1983_v18, %v2565_v7  ;;  %v653_v23 = vpop.f32.mrb[11].mxu1 }
 0x101   :  { %v398_v5 = vadd.f32 %v2565_v7, %v397_v3  ;;  %v689_v12 = vmax.f32 %v395_v63, 0.0  ;;  %v753_v26 = vmax.f32 %v651_v17, 0.0  ;;  %v654_v27 = vadd.f32 %v2565_v7, %v653_v23 }
 0x102   :  { %v692_v9 = vmax.f32 %v406_v2, 0.0  ;;  %v756_v30 = vmax.f32 %v662_v22, 0.0 }
 0x103   :  { %v690_v13 = vmax.f32 %v398_v5, 0.0  ;;  %v754_v33 = vmax.f32 %v654_v27, 0.0 }
 0x104   :  { %v766_v16 = vpack.c.bf16 %v692_v9, %v691_v8  ;;  %v2603_v35 = vpack.c.bf16 %v756_v30, %v755_v21 }
 0x105   :  { %v765_v19 = vpack.c.bf16 %v690_v13, %v689_v12  ;;  %v1922_v20 = vpop.f32.mrb[12].mxu0  ;;  %v2605_v38 = vpack.c.bf16 %v754_v33, %v753_v26  ;;  %v1986_v39 = vpop.f32.mrb[12].mxu1 }
 0x106   :  { %v419_v24 = vadd.f32 %v1922_v20, %v2565_v7  ;;  %v410_v25 = vpop.f32.mrb[13].mxu0  ;;  %v675_v43 = vadd.f32 %v1986_v39, %v2565_v7  ;;  %v666_v44 = vpop.f32.mrb[13].mxu1 }
 0x107   :  { %v411_v28 = vadd.f32 %v2565_v7, %v410_v25  ;;  %v1923_v29 = vpop.f32.mrb[14].mxu0  ;;  %2012 = vmatprep.mubr.bf16.mxu1 %v765_v19  ;;  %v667_v47 = vadd.f32 %v2565_v7, %v666_v44  ;;  %v1987_v48 = vpop.f32.mrb[14].mxu1 }
 0x108   :  { %v422_v31 = vadd.f32 %v1923_v29, %v2565_v7  ;;  %v413_v32 = vpop.f32.mrb[15].mxu0  ;;  %2013 = vmatmul.mubr.bf16.gmra.mrb[24].mxu1 %v766_v16  ;;  %v695_v36 = vmax.f32 %v419_v24, 0.0  ;;  %v759_v51 = vmax.f32 %v675_v43, 0.0  ;;  %v678_v52 = vadd.f32 %v1987_v48, %v2565_v7  ;;  %v669_v53 = vpop.f32.mrb[15].mxu1 }
 0x109   :  { %v414_v34 = vadd.f32 %v2565_v7, %v413_v32  ;;  %v693_v40 = vmax.f32 %v411_v28, 0.0  ;;  %v757_v56 = vmax.f32 %v667_v47, 0.0  ;;  %v670_v57 = vadd.f32 %v2565_v7, %v669_v53 }
 0x10a   :  { %v696_v37 = vmax.f32 %v422_v31, 0.0  ;;  %v760_v60 = vmax.f32 %v678_v52, 0.0 }
 0x10b   :  { %v694_v41 = vmax.f32 %v414_v34, 0.0  ;;  %v758_v63 = vmax.f32 %v670_v57, 0.0 }
 0x10c   :  { %v768_v46 = vpack.c.bf16 %v696_v37, %v695_v36  ;;  %v2615_v1 = vpack.c.bf16 %v760_v60, %v759_v51 }
 0x10d   :  { %v767_v49 = vpack.c.bf16 %v694_v41, %v693_v40  ;;  %v1926_v50 = vpop.f32.mrb[16].mxu0  ;;  %v2617_v4 = vpack.c.bf16 %v758_v63, %v757_v56 }
 0x10e   :  { %v435_v54 = vadd.f32 %v1926_v50, %v2565_v7  ;;  %v426_v55 = vpop.f32.mrb[17].mxu0 }
 0x10f   :  { %v427_v58 = vadd.f32 %v2565_v7, %v426_v55  ;;  %v1927_v59 = vpop.f32.mrb[18].mxu0  ;;  %2016 = vmatprep.mubr.bf16.mxu1 %v767_v49 }
 0x110   :  { %v438_v61 = vadd.f32 %v1927_v59, %v2565_v7  ;;  %v429_v62 = vpop.f32.mrb[19].mxu0  ;;  %2017 = vmatmul.mubr.bf16.gmra.mrb[28].mxu1 %v768_v46  ;;  %v699_v2 = vmax.f32 %v435_v54, 0.0 }
 0x111   :  { %v430_v0 = vadd.f32 %v2565_v7, %v429_v62  ;;  %v697_v5 = vmax.f32 %v427_v58, 0.0 }
 0x112   :  { %v700_v3 = vmax.f32 %v438_v61, 0.0 }
 0x113   :  { %v698_v8 = vmax.f32 %v430_v0, 0.0 }
 0x114   :  { %v770_v9 = vpack.c.bf16 %v700_v3, %v699_v2 }
 0x115   :  { %v769_v11 = vpack.c.bf16 %v698_v8, %v697_v5  ;;  %v1930_v12 = vpop.f32.mrb[20].mxu0 }
 0x116   :  { %v451_v13 = vadd.f32 %v1930_v12, %v2565_v7  ;;  %v442_v14 = vpop.f32.mrb[21].mxu0 }
 0x117   :  { %v443_v15 = vadd.f32 %v2565_v7, %v442_v14  ;;  %v1931_v16 = vpop.f32.mrb[22].mxu0  ;;  %2020 = vmatprep.mubr.bf16.mxu1 %v769_v11 }
 0x118   :  { %v454_v17 = vadd.f32 %v1931_v16, %v2565_v7  ;;  %v445_v18 = vpop.f32.mrb[23].mxu0  ;;  %2021 = vmatmul.mubr.bf16.gmra.mrb[32].mxu1 %v770_v9  ;;  %v703_v20 = vmax.f32 %v451_v13, 0.0 }
 0x119   :  { %v446_v19 = vadd.f32 %v2565_v7, %v445_v18  ;;  %v701_v22 = vmax.f32 %v443_v15, 0.0 }
 0x11a   :  { %v704_v21 = vmax.f32 %v454_v17, 0.0 }
 0x11b   :  { %v702_v23 = vmax.f32 %v446_v19, 0.0 }
 0x11c   :  { %v772_v24 = vpack.c.bf16 %v704_v21, %v703_v20 }
 0x11d   :  { %v771_v25 = vpack.c.bf16 %v702_v23, %v701_v22  ;;  %v1934_v26 = vpop.f32.mrb[24].mxu0 }
 0x11e   :  { %v467_v27 = vadd.f32 %v1934_v26, %v2565_v7  ;;  %v458_v28 = vpop.f32.mrb[25].mxu0 }
 0x11f   :  { %v459_v29 = vadd.f32 %v2565_v7, %v458_v28  ;;  %v1935_v30 = vpop.f32.mrb[26].mxu0  ;;  %2024 = vmatprep.mubr.bf16.mxu1 %v771_v25 }
 0x120   :  { %v470_v31 = vadd.f32 %v1935_v30, %v2565_v7  ;;  %v461_v32 = vpop.f32.mrb[27].mxu0  ;;  %2025 = vmatmul.mubr.bf16.gmra.mrb[36].mxu1 %v772_v24  ;;  %v707_v34 = vmax.f32 %v467_v27, 0.0 }
 0x121   :  { %v462_v33 = vadd.f32 %v2565_v7, %v461_v32  ;;  %v705_v37 = vmax.f32 %v459_v29, 0.0 }
 0x122   :  { %v708_v36 = vmax.f32 %v470_v31, 0.0 }
 0x123   :  { %v706_v39 = vmax.f32 %v462_v33, 0.0 }
 0x124   :  { %v774_v40 = vpack.c.bf16 %v708_v36, %v707_v34 }
 0x125   :  { %v773_v41 = vpack.c.bf16 %v706_v39, %v705_v37  ;;  %v1938_v43 = vpop.f32.mrb[28].mxu0 }
 0x126   :  { %v483_v44 = vadd.f32 %v1938_v43, %v2565_v7  ;;  %v474_v46 = vpop.f32.mrb[29].mxu0 }
 0x127   :  { %v475_v47 = vadd.f32 %v2565_v7, %v474_v46  ;;  %v1939_v48 = vpop.f32.mrb[30].mxu0  ;;  %2028 = vmatprep.mubr.bf16.mxu1 %v773_v41 }
 0x128   :  { %v486_v49 = vadd.f32 %v1939_v48, %v2565_v7  ;;  %v477_v50 = vpop.f32.mrb[31].mxu0  ;;  %2029 = vmatmul.mubr.bf16.gmra.mrb[40].mxu1 %v774_v40  ;;  %v711_v52 = vmax.f32 %v483_v44, 0.0 }
 0x129   :  { %v478_v51 = vadd.f32 %v2565_v7, %v477_v50  ;;  %v709_v54 = vmax.f32 %v475_v47, 0.0 }
 0x12a   :  { %v712_v53 = vmax.f32 %v486_v49, 0.0 }
 0x12b   :  { %v710_v55 = vmax.f32 %v478_v51, 0.0 }
 0x12c   :  { %v776_v56 = vpack.c.bf16 %v712_v53, %v711_v52 }
 0x12d   :  { %v775_v57 = vpack.c.bf16 %v710_v55, %v709_v54  ;;  %v1942_v58 = vpop.f32.mrb[32].mxu0 }
 0x12e   :  { %v499_v59 = vadd.f32 %v1942_v58, %v2565_v7  ;;  %v490_v60 = vpop.f32.mrb[33].mxu0 }
 0x12f   :  { %v491_v61 = vadd.f32 %v2565_v7, %v490_v60  ;;  %v1943_v62 = vpop.f32.mrb[34].mxu0  ;;  %2032 = vmatprep.mubr.bf16.mxu1 %v775_v57 }
 0x130   :  { %v502_v63 = vadd.f32 %v1943_v62, %v2565_v7  ;;  %v493_v0 = vpop.f32.mrb[35].mxu0  ;;  %2033 = vmatmul.mubr.bf16.gmra.mrb[44].mxu1 %v776_v56  ;;  %v715_v3 = vmax.f32 %v499_v59, 0.0 }
 0x131   :  { %v494_v2 = vadd.f32 %v2565_v7, %v493_v0  ;;  %v713_v8 = vmax.f32 %v491_v61, 0.0 }
 0x132   :  { %v716_v5 = vmax.f32 %v502_v63, 0.0 }
 0x133   :  { %v714_v9 = vmax.f32 %v494_v2, 0.0 }
 0x134   :  { %v778_v11 = vpack.c.bf16 %v716_v5, %v715_v3 }
 0x135   :  { %v777_v12 = vpack.c.bf16 %v714_v9, %v713_v8  ;;  %v1946_v13 = vpop.f32.mrb[36].mxu0 }
 0x136   :  { %v515_v14 = vadd.f32 %v1946_v13, %v2565_v7  ;;  %v506_v15 = vpop.f32.mrb[37].mxu0 }
 0x137   :  { %v507_v16 = vadd.f32 %v2565_v7, %v506_v15  ;;  %v1947_v17 = vpop.f32.mrb[38].mxu0  ;;  %2036 = vmatprep.mubr.bf16.mxu1 %v777_v12 }
 0x138   :  { %v518_v18 = vadd.f32 %v1947_v17, %v2565_v7  ;;  %v509_v19 = vpop.f32.mrb[39].mxu0  ;;  %2037 = vmatmul.mubr.bf16.gmra.mrb[48].mxu1 %v778_v11  ;;  %v719_v21 = vmax.f32 %v515_v14, 0.0 }
 0x139   :  { %v510_v20 = vadd.f32 %v2565_v7, %v509_v19  ;;  %v717_v23 = vmax.f32 %v507_v16, 0.0 }
 0x13a   :  { %v720_v22 = vmax.f32 %v518_v18, 0.0 }
 0x13b   :  { %v718_v24 = vmax.f32 %v510_v20, 0.0 }
 0x13c   :  { %v780_v25 = vpack.c.bf16 %v720_v22, %v719_v21 }
 0x13d   :  { %v779_v26 = vpack.c.bf16 %v718_v24, %v717_v23  ;;  %v1950_v27 = vpop.f32.mrb[40].mxu0 }
 0x13e   :  { %v531_v28 = vadd.f32 %v1950_v27, %v2565_v7  ;;  %v522_v29 = vpop.f32.mrb[41].mxu0 }
 0x13f   :  { %v523_v30 = vadd.f32 %v2565_v7, %v522_v29  ;;  %v1951_v31 = vpop.f32.mrb[42].mxu0  ;;  %2040 = vmatprep.mubr.bf16.mxu1 %v779_v26 }
 0x140   :  { %v534_v32 = vadd.f32 %v1951_v31, %v2565_v7  ;;  %v525_v33 = vpop.f32.mrb[43].mxu0  ;;  %2041 = vmatmul.mubr.bf16.gmra.mrb[52].mxu1 %v780_v25  ;;  %v723_v36 = vmax.f32 %v531_v28, 0.0 }
 0x141   :  { %v526_v34 = vadd.f32 %v2565_v7, %v525_v33  ;;  %v721_v39 = vmax.f32 %v523_v30, 0.0 }
 0x142   :  { %v724_v37 = vmax.f32 %v534_v32, 0.0 }
 0x143   :  { %v722_v40 = vmax.f32 %v526_v34, 0.0 }
 0x144   :  { %v782_v41 = vpack.c.bf16 %v724_v37, %v723_v36 }
 0x145   :  { %v781_v43 = vpack.c.bf16 %v722_v40, %v721_v39  ;;  %v1954_v44 = vpop.f32.mrb[44].mxu0 }
 0x146   :  { %v547_v46 = vadd.f32 %v1954_v44, %v2565_v7  ;;  %v538_v47 = vpop.f32.mrb[45].mxu0 }
 0x147   :  { %v539_v48 = vadd.f32 %v2565_v7, %v538_v47  ;;  %v1955_v49 = vpop.f32.mrb[46].mxu0  ;;  %2044 = vmatprep.mubr.bf16.mxu1 %v781_v43 }
 0x148   :  { %v550_v50 = vadd.f32 %v1955_v49, %v2565_v7  ;;  %v541_v51 = vpop.f32.mrb[47].mxu0  ;;  %2045 = vmatmul.mubr.bf16.gmra.mrb[56].mxu1 %v782_v41  ;;  %v727_v53 = vmax.f32 %v547_v46, 0.0 }
 0x149   :  { %v542_v52 = vadd.f32 %v2565_v7, %v541_v51  ;;  %v725_v55 = vmax.f32 %v539_v48, 0.0 }
 0x14a   :  { %v728_v54 = vmax.f32 %v550_v50, 0.0 }
 0x14b   :  { %v726_v56 = vmax.f32 %v542_v52, 0.0 }
 0x14c   :  { %v784_v57 = vpack.c.bf16 %v728_v54, %v727_v53 }
 0x14d   :  { %v783_v58 = vpack.c.bf16 %v726_v56, %v725_v55  ;;  %v1958_v59 = vpop.f32.mrb[48].mxu0 }
 0x14e   :  { %v563_v60 = vadd.f32 %v1958_v59, %v2565_v7  ;;  %v554_v61 = vpop.f32.mrb[49].mxu0 }
 0x14f   :  { %v555_v62 = vadd.f32 %v2565_v7, %v554_v61  ;;  %v1959_v63 = vpop.f32.mrb[50].mxu0  ;;  %2048 = vmatprep.mubr.bf16.mxu1 %v783_v58 }
 0x150   :  { %v566_v0 = vadd.f32 %v1959_v63, %v2565_v7  ;;  %v557_v2 = vpop.f32.mrb[51].mxu0  ;;  %2049 = vmatmul.mubr.bf16.gmra.mrb[60].mxu1 %v784_v57  ;;  %v731_v5 = vmax.f32 %v563_v60, 0.0 }
 0x151   :  { %v558_v3 = vadd.f32 %v2565_v7, %v557_v2  ;;  %v729_v9 = vmax.f32 %v555_v62, 0.0 }
 0x152   :  { %v732_v8 = vmax.f32 %v566_v0, 0.0  ;;  %v2683_v0 = vld [vmem:[%s2894_s5] sm:$0xf] }
 0x153   :  { %v730_v11 = vmax.f32 %v558_v3, 0.0  ;;  %1867 = vmatprep.mubr.msk.bf16.mxu0 %vm1346_vm2, %v2683_v0 }
 0x154   :  { %v786_v12 = vpack.c.bf16 %v732_v8, %v731_v5 }
 0x155   :  { %v785_v13 = vpack.c.bf16 %v730_v11, %v729_v9  ;;  %v1962_v14 = vpop.f32.mrb[52].mxu0 }
 0x156   :  { %v579_v15 = vadd.f32 %v1962_v14, %v2565_v7  ;;  %v570_v16 = vpop.f32.mrb[53].mxu0 }
 0x157   :  { %2052 = vmatprep.mubr.bf16.mxu1 %v785_v13  ;;  %v571_v17 = vadd.f32 %v2565_v7, %v570_v16  ;;  %v1963_v18 = vpop.f32.mrb[54].mxu0 }
 0x158   :  { %2053 = vmatmul.mubr.bf16.gmra.mrb[64].mxu1 %v786_v12  ;;  %v582_v19 = vadd.f32 %v1963_v18, %v2565_v7  ;;  %v573_v20 = vpop.f32.mrb[55].mxu0  ;;  %v735_v22 = vmax.f32 %v579_v15, 0.0 }
 0x159   :  { %v574_v21 = vadd.f32 %v2565_v7, %v573_v20  ;;  %v733_v24 = vmax.f32 %v571_v17, 0.0 }
 0x15a   :  { %v736_v23 = vmax.f32 %v582_v19, 0.0 }
 0x15b   :  { %v734_v25 = vmax.f32 %v574_v21, 0.0 }
 0x15c   :  { %v788_v26 = vpack.c.bf16 %v736_v23, %v735_v22 }
 0x15d   :  { %v787_v27 = vpack.c.bf16 %v734_v25, %v733_v24  ;;  %v1966_v28 = vpop.f32.mrb[56].mxu0 }
 0x15e   :  { %v595_v29 = vadd.f32 %v1966_v28, %v2565_v7  ;;  %v586_v30 = vpop.f32.mrb[57].mxu0 }
 0x15f   :  { %2056 = vmatprep.mubr.bf16.mxu1 %v787_v27  ;;  %v587_v31 = vadd.f32 %v2565_v7, %v586_v30  ;;  %v1967_v32 = vpop.f32.mrb[58].mxu0 }
 0x160   :  { %2057 = vmatmul.mubr.bf16.gmra.mrb[68].mxu1 %v788_v26  ;;  %v598_v33 = vadd.f32 %v1967_v32, %v2565_v7  ;;  %v589_v34 = vpop.f32.mrb[59].mxu0  ;;  %v739_v37 = vmax.f32 %v595_v29, 0.0 }
 0x161   :  { %v590_v36 = vadd.f32 %v2565_v7, %v589_v34  ;;  %v737_v40 = vmax.f32 %v587_v31, 0.0 }
 0x162   :  { %v740_v39 = vmax.f32 %v598_v33, 0.0 }
 0x163   :  { %v738_v41 = vmax.f32 %v590_v36, 0.0 }
 0x164   :  { %v790_v43 = vpack.c.bf16 %v740_v39, %v739_v37 }
 0x165   :  { %v789_v44 = vpack.c.bf16 %v738_v41, %v737_v40  ;;  %v1970_v46 = vpop.f32.mrb[60].mxu0 }
 0x166   :  { %v611_v47 = vadd.f32 %v1970_v46, %v2565_v7  ;;  %v602_v48 = vpop.f32.mrb[61].mxu0 }
 0x167   :  { %v603_v49 = vadd.f32 %v2565_v7, %v602_v48  ;;  %v1971_v50 = vpop.f32.mrb[62].mxu0  ;;  %2060 = vmatprep.mubr.bf16.mxu1 %v789_v44 }
 0x168   :  { %v614_v51 = vadd.f32 %v1971_v50, %v2565_v7  ;;  %v605_v52 = vpop.f32.mrb[63].mxu0  ;;  %2061 = vmatmul.mubr.bf16.gmra.mrb[72].mxu1 %v790_v43  ;;  %v743_v54 = vmax.f32 %v611_v47, 0.0 }
 0x169   :  { %v606_v53 = vadd.f32 %v2565_v7, %v605_v52  ;;  %v741_v56 = vmax.f32 %v603_v49, 0.0  ;;  %v2674_v7 = vld [vmem:[%s2893_s4] ss:$0 sm:$0xff] }
 0x16a   :  { %v744_v55 = vmax.f32 %v614_v51, 0.0 }
 0x16b   :  { %v742_v57 = vmax.f32 %v606_v53, 0.0 }
 0x16c   :  { %v792_v58 = vpack.c.bf16 %v744_v55, %v743_v54 }
 0x16d   :  { %v791_v59 = vpack.c.bf16 %v742_v57, %v741_v56 }
 0x16f   :  { %2064 = vmatprep.mubr.bf16.mxu1 %v791_v59 }
 0x170   :  { %2065 = vmatmul.mubr.bf16.gmra.mrb[76].mxu1 %v792_v58 }
 0x171   :  { %2068 = vmatprep.mubr.bf16.mxu1 %v2581_v45 }
 0x178   :  { %2069 = vmatmul.mubr.bf16.gmra.mrb[80].mxu1 %v2579_v42 }
 0x179   :  { %2072 = vmatprep.mubr.bf16.mxu1 %v2593_v10 }
 0x180   :  { %2073 = vmatmul.mubr.bf16.gmra.mrb[84].mxu1 %v2591_v6 }
 0x181   :  { %2076 = vmatprep.mubr.bf16.mxu1 %v2605_v38 }
 0x188   :  { %2077 = vmatmul.mubr.bf16.gmra.mrb[88].mxu1 %v2603_v35 }
 0x189   :  { %2080 = vmatprep.mubr.bf16.mxu1 %v2617_v4 }
 0x190   :  { %2081 = vmatmul.mubr.bf16.gmra.mrb[92].mxu1 %v2615_v1 }
 0x191   :  { %1885 = vmatprep.mubr.msk.bf16.mxu1 %vm1346_vm2, %v2683_v0 }
 0x1cb   :  { %v2006_v45 = vpop.f32.mrb[16].mxu1 }
 0x1cc   :  { %v915_v42 = vadd.f32 %v2006_v45, %v2674_v7  ;;  %v906_v60 = vpop.f32.mrb[17].mxu1 }
 0x1cd   :  { %v907_v10 = vadd.f32 %v2674_v7, %v906_v60  ;;  %v2007_v6 = vpop.f32.mrb[18].mxu1 }
 0x1ce   :  { %v918_v38 = vadd.f32 %v2007_v6, %v2674_v7  ;;  %v909_v61 = vpop.f32.mrb[19].mxu1  ;;  %v1227_v4 = vmax.f32 %v915_v42, 0.0 }
 0x1cf   :  { %v910_v35 = vadd.f32 %v2674_v7, %v909_v61  ;;  %v1225_v1 = vmax.f32 %v907_v10, 0.0 }
 0x1d0   :  { %v1228_v62 = vmax.f32 %v918_v38, 0.0 }
 0x1d1   :  { %v1226_v63 = vmax.f32 %v910_v35, 0.0 }
 0x1d2   :  { %v2685_v2 = vpack.c.bf16 %v1228_v62, %v1227_v4 }
 0x1d3   :  { %v2691_v3 = vpack.c.bf16 %v1226_v63, %v1225_v1  ;;  %v2010_v5 = vpop.f32.mrb[20].mxu1 }
 0x1d4   :  { %v931_v8 = vadd.f32 %v2010_v5, %v2674_v7  ;;  %v922_v9 = vpop.f32.mrb[21].mxu1 }
 0x1d5   :  { %v923_v11 = vadd.f32 %v2674_v7, %v922_v9  ;;  %v2011_v12 = vpop.f32.mrb[22].mxu1 }
 0x1d6   :  { %v934_v13 = vadd.f32 %v2011_v12, %v2674_v7  ;;  %v925_v14 = vpop.f32.mrb[23].mxu1  ;;  %v1231_v16 = vmax.f32 %v931_v8, 0.0  ;;  %v1351_v8 = vsel %vm1346_vm2, %v2691_v3, 0 }
 0x1d7   :  { %v926_v15 = vadd.f32 %v2674_v7, %v925_v14  ;;  %v1229_v18 = vmax.f32 %v923_v11, 0.0 }
 0x1d8   :  { %v1232_v17 = vmax.f32 %v934_v13, 0.0 }
 0x1d9   :  { %v1230_v19 = vmax.f32 %v926_v15, 0.0 }
 0x1da   :  { %v2697_v20 = vpack.c.bf16 %v1232_v17, %v1231_v16 }
 0x1db   :  { %v2699_v21 = vpack.c.bf16 %v1230_v19, %v1229_v18  ;;  %v2014_v22 = vpop.f32.mrb[24].mxu1 }
 0x1dc   :  { %v947_v23 = vadd.f32 %v2014_v22, %v2674_v7  ;;  %v938_v24 = vpop.f32.mrb[25].mxu1 }
 0x1dd   :  { %v939_v25 = vadd.f32 %v2674_v7, %v938_v24  ;;  %v2015_v26 = vpop.f32.mrb[26].mxu1 }
 0x1de   :  { %v950_v27 = vadd.f32 %v2015_v26, %v2674_v7  ;;  %v941_v28 = vpop.f32.mrb[27].mxu1  ;;  %v1235_v30 = vmax.f32 %v947_v23, 0.0 }
 0x1df   :  { %v942_v29 = vadd.f32 %v2674_v7, %v941_v28  ;;  %v1233_v32 = vmax.f32 %v939_v25, 0.0  ;;  %v1354_v25 = vsel %vm1346_vm2, %v2685_v2, 0 }
 0x1e0   :  { %v1236_v31 = vmax.f32 %v950_v27, 0.0 }
 0x1e1   :  { %v1234_v33 = vmax.f32 %v942_v29, 0.0 }
 0x1e2   :  { %v2705_v34 = vpack.c.bf16 %v1236_v31, %v1235_v30 }
 0x1e3   :  { %v2707_v36 = vpack.c.bf16 %v1234_v33, %v1233_v32  ;;  %v2018_v37 = vpop.f32.mrb[28].mxu1 }
 0x1e4   :  { %v963_v39 = vadd.f32 %v2018_v37, %v2674_v7  ;;  %v954_v40 = vpop.f32.mrb[29].mxu1 }
 0x1e5   :  { %v955_v41 = vadd.f32 %v2674_v7, %v954_v40  ;;  %v2019_v43 = vpop.f32.mrb[30].mxu1 }
 0x1e6   :  { %v966_v44 = vadd.f32 %v2019_v43, %v2674_v7  ;;  %v957_v46 = vpop.f32.mrb[31].mxu1  ;;  %v1239_v48 = vmax.f32 %v963_v39, 0.0 }
 0x1e7   :  { %v958_v47 = vadd.f32 %v2674_v7, %v957_v46  ;;  %v1237_v50 = vmax.f32 %v955_v41, 0.0 }
 0x1e8   :  { %v1240_v49 = vmax.f32 %v966_v44, 0.0  ;;  %v1357_v44 = vsel %vm1346_vm2, %v2699_v21, 0 }
 0x1e9   :  { %v1238_v51 = vmax.f32 %v958_v47, 0.0 }
 0x1ea   :  { %v2713_v52 = vpack.c.bf16 %v1240_v49, %v1239_v48 }
 0x1eb   :  { %v2715_v53 = vpack.c.bf16 %v1238_v51, %v1237_v50  ;;  %v2022_v54 = vpop.f32.mrb[32].mxu1 }
 0x1ec   :  { %v979_v55 = vadd.f32 %v2022_v54, %v2674_v7  ;;  %v970_v56 = vpop.f32.mrb[33].mxu1 }
 0x1ed   :  { %v971_v57 = vadd.f32 %v2674_v7, %v970_v56  ;;  %v2023_v58 = vpop.f32.mrb[34].mxu1 }
 0x1ee   :  { %v982_v59 = vadd.f32 %v2023_v58, %v2674_v7  ;;  %v973_v45 = vpop.f32.mrb[35].mxu1  ;;  %v1243_v60 = vmax.f32 %v979_v55, 0.0 }
 0x1ef   :  { %v974_v42 = vadd.f32 %v2674_v7, %v973_v45  ;;  %v1241_v6 = vmax.f32 %v971_v57, 0.0 }
 0x1f0   :  { %v1244_v10 = vmax.f32 %v982_v59, 0.0 }
 0x1f1   :  { %v1242_v38 = vmax.f32 %v974_v42, 0.0  ;;  %v1360_v42 = vsel %vm1346_vm2, %v2697_v20, 0 }
 0x1f2   :  { %v1315_v61 = vpack.c.bf16 %v1244_v10, %v1243_v60 }
 0x1f3   :  { %v1314_v35 = vpack.c.bf16 %v1242_v38, %v1241_v6  ;;  %v2026_v4 = vpop.f32.mrb[36].mxu1 }
 0x1f4   :  { %v995_v62 = vadd.f32 %v2026_v4, %v2674_v7  ;;  %v986_v1 = vpop.f32.mrb[37].mxu1 }
 0x1f5   :  { %v987_v63 = vadd.f32 %v2674_v7, %v986_v1  ;;  %v2027_v5 = vpop.f32.mrb[38].mxu1  ;;  %2118 = vmatprep.subr.msk.bf16.mxu0 %vm1346_vm2, %v1314_v35 }
 0x1f6   :  { %v998_v9 = vadd.f32 %v2027_v5, %v2674_v7  ;;  %v989_v11 = vpop.f32.mrb[39].mxu1  ;;  %1852 = vmatpush3.bf16.xpose.msra.mxu0 %v1351_v8  ;;  %v1247_v13 = vmax.f32 %v995_v62, 0.0 }
 0x1f7   :  { %v990_v12 = vadd.f32 %v2674_v7, %v989_v11  ;;  %2119 = vmatprep.subr.msk.bf16.mxu0 %vm1346_vm2, %v1315_v61  ;;  %v1245_v15 = vmax.f32 %v987_v63, 0.0  ;;  %v1363_v11 = vsel %vm1346_vm2, %v2707_v36, 0 }
 0x1f8   :  { %v1248_v14 = vmax.f32 %v998_v9, 0.0 }
 0x1f9   :  { %v1246_v16 = vmax.f32 %v990_v12, 0.0 }
 0x1fa   :  { %v1317_v17 = vpack.c.bf16 %v1248_v14, %v1247_v13 }
 0x1fb   :  { %v1316_v18 = vpack.c.bf16 %v1246_v16, %v1245_v15  ;;  %v2030_v19 = vpop.f32.mrb[40].mxu1 }
 0x1fc   :  { %v1011_v22 = vadd.f32 %v2030_v19, %v2674_v7  ;;  %v1002_v23 = vpop.f32.mrb[41].mxu1 }
 0x1fd   :  { %v1003_v3 = vadd.f32 %v2674_v7, %v1002_v23  ;;  %v2031_v24 = vpop.f32.mrb[42].mxu1 }
 0x1fe   :  { %v1014_v26 = vadd.f32 %v2031_v24, %v2674_v7  ;;  %v1005_v27 = vpop.f32.mrb[43].mxu1  ;;  %1854 = vmatpush3.bf16.xpose.msra.mxu0 %v1354_v25  ;;  %v1251_v29 = vmax.f32 %v1011_v22, 0.0 }
 0x1ff   :  { %v1006_v28 = vadd.f32 %v2674_v7, %v1005_v27  ;;  %2120 = vmatprep.subr.msk.bf16.mxu0 %vm1346_vm2, %v1316_v18  ;;  %v1249_v31 = vmax.f32 %v1003_v3, 0.0 }
 0x200   :  { %v1252_v30 = vmax.f32 %v1014_v26, 0.0  ;;  %v1366_v26 = vsel %vm1346_vm2, %v2705_v34, 0 }
 0x201   :  { %v1250_v32 = vmax.f32 %v1006_v28, 0.0 }
 0x202   :  { %v1319_v33 = vpack.c.bf16 %v1252_v30, %v1251_v29 }
 0x203   :  { %v1318_v37 = vpack.c.bf16 %v1250_v32, %v1249_v31  ;;  %v2034_v39 = vpop.f32.mrb[44].mxu1 }
 0x204   :  { %v1027_v40 = vadd.f32 %v2034_v39, %v2674_v7  ;;  %v1018_v41 = vpop.f32.mrb[45].mxu1 }
 0x205   :  { %v1019_v2 = vadd.f32 %v2674_v7, %v1018_v41  ;;  %v2035_v43 = vpop.f32.mrb[46].mxu1 }
 0x206   :  { %v1030_v46 = vadd.f32 %v2035_v43, %v2674_v7  ;;  %v1021_v47 = vpop.f32.mrb[47].mxu1  ;;  %1856 = vmatpush3.bf16.xpose.msra.mxu0 %v1357_v44  ;;  %v1255_v49 = vmax.f32 %v1027_v40, 0.0  ;;  %v1369_v44 = vsel %vm1346_vm2, %v2715_v53, 0 }
 0x207   :  { %v1022_v48 = vadd.f32 %v2674_v7, %v1021_v47  ;;  %2121 = vmatprep.subr.msk.bf16.mxu0 %vm1346_vm2, %v1317_v17  ;;  %v1253_v51 = vmax.f32 %v1019_v2, 0.0 }
 0x208   :  { %v1256_v50 = vmax.f32 %v1030_v46, 0.0 }
 0x209   :  { %v1254_v54 = vmax.f32 %v1022_v48, 0.0 }
 0x20a   :  { %v2743_v55 = vpack.c.bf16 %v1256_v50, %v1255_v49 }
 0x20b   :  { %v1320_v56 = vpack.c.bf16 %v1254_v54, %v1253_v51  ;;  %v2038_v57 = vpop.f32.mrb[48].mxu1 }
 0x20c   :  { %v1043_v58 = vadd.f32 %v2038_v57, %v2674_v7  ;;  %v1034_v59 = vpop.f32.mrb[49].mxu1 }
 0x20d   :  { %v1035_v21 = vadd.f32 %v2674_v7, %v1034_v59  ;;  %v2039_v45 = vpop.f32.mrb[50].mxu1 }
 0x20e   :  { %v1046_v60 = vadd.f32 %v2039_v45, %v2674_v7  ;;  %v1037_v10 = vpop.f32.mrb[51].mxu1  ;;  %1858 = vmatpush3.bf16.xpose.msra.mxu0 %v1360_v42  ;;  %v1259_v38 = vmax.f32 %v1043_v58, 0.0  ;;  %v1372_v42 = vsel %vm1346_vm2, %v2713_v52, 0 }
 0x20f   :  { %v1038_v6 = vadd.f32 %v2674_v7, %v1037_v10  ;;  %2122 = vmatprep.subr.msk.bf16.mxu0 %vm1346_vm2, %v1318_v37  ;;  %v1257_v35 = vmax.f32 %v1035_v21, 0.0 }
 0x210   :  { %v1260_v61 = vmax.f32 %v1046_v60, 0.0 }
 0x211   :  { %v1258_v4 = vmax.f32 %v1038_v6, 0.0  ;;  %v2196_v6 = vmov 0.0  }
 0x212   :  { %v2752_v62 = vpack.c.bf16 %v1260_v61, %v1259_v38 }
 0x213   :  { %v2754_v1 = vpack.c.bf16 %v1258_v4, %v1257_v35  ;;  %v2042_v63 = vpop.f32.mrb[52].mxu1 }
 0x214   :  { %v1059_v5 = vadd.f32 %v2042_v63, %v2674_v7  ;;  %v1050_v20 = vpop.f32.mrb[53].mxu1 }
 0x215   :  { %v1051_v8 = vadd.f32 %v2674_v7, %v1050_v20  ;;  %v2043_v9 = vpop.f32.mrb[54].mxu1  ;;  %v1399_v52 = vsel %vm1346_vm2, %v2754_v1, 0 }
 0x216   :  { %v1062_v12 = vadd.f32 %v2043_v9, %v2674_v7  ;;  %v1053_v13 = vpop.f32.mrb[55].mxu1  ;;  %1860 = vmatpush3.bf16.xpose.msra.mxu0 %v1363_v11  ;;  %v1263_v15 = vmax.f32 %v1059_v5, 0.0 }
 0x217   :  { %v1054_v14 = vadd.f32 %v2674_v7, %v1053_v13  ;;  %2123 = vmatprep.subr.msk.bf16.mxu0 %vm1346_vm2, %v1319_v33  ;;  %v1261_v17 = vmax.f32 %v1051_v8, 0.0 }
 0x218   :  { %v1264_v16 = vmax.f32 %v1062_v12, 0.0 }
 0x219   :  { %v1262_v18 = vmax.f32 %v1054_v14, 0.0 }
 0x21a   :  { %v2763_v19 = vpack.c.bf16 %v1264_v16, %v1263_v15 }
 0x21b   :  { %v2765_v22 = vpack.c.bf16 %v1262_v18, %v1261_v17  ;;  %v2046_v23 = vpop.f32.mrb[56].mxu1 }
 0x21c   :  { %v1075_v3 = vadd.f32 %v2046_v23, %v2674_v7  ;;  %v1066_v36 = vpop.f32.mrb[57].mxu1 }
 0x21d   :  { %v1067_v24 = vadd.f32 %v2674_v7, %v1066_v36  ;;  %v2047_v25 = vpop.f32.mrb[58].mxu1 }
 0x21e   :  { %v1078_v27 = vadd.f32 %v2047_v25, %v2674_v7  ;;  %v1069_v28 = vpop.f32.mrb[59].mxu1  ;;  %1862 = vmatpush3.bf16.xpose.msra.mxu0 %v1366_v26  ;;  %v1267_v30 = vmax.f32 %v1075_v3, 0.0  ;;  %v1402_v26 = vsel %vm1346_vm2, %v2752_v62, 0 }
 0x21f   :  { %v1070_v29 = vadd.f32 %v2674_v7, %v1069_v28  ;;  %2124 = vmatprep.subr.msk.bf16.mxu0 %vm1346_vm2, %v1320_v56  ;;  %v1265_v32 = vmax.f32 %v1067_v24, 0.0 }
 0x220   :  { %v1268_v31 = vmax.f32 %v1078_v27, 0.0 }
 0x221   :  { %v1266_v33 = vmax.f32 %v1070_v29, 0.0 }
 0x222   :  { %v2774_v37 = vpack.c.bf16 %v1268_v31, %v1267_v30 }
 0x223   :  { %v2776_v39 = vpack.c.bf16 %v1266_v33, %v1265_v32  ;;  %v2050_v40 = vpop.f32.mrb[60].mxu1 }
 0x224   :  { %v1091_v41 = vadd.f32 %v2050_v40, %v2674_v7  ;;  %v1082_v34 = vpop.f32.mrb[61].mxu1 }
 0x225   :  { %v1083_v2 = vadd.f32 %v2674_v7, %v1082_v34  ;;  %v2051_v43 = vpop.f32.mrb[62].mxu1 }
 0x226   :  { %v1094_v46 = vadd.f32 %v2051_v43, %v2674_v7  ;;  %v1085_v47 = vpop.f32.mrb[63].mxu1  ;;  %1864 = vmatpush3.bf16.xpose.msra.mxu0 %v1369_v44  ;;  %v1271_v49 = vmax.f32 %v1091_v41, 0.0 }
 0x227   :  { %v1086_v48 = vadd.f32 %v2674_v7, %v1085_v47  ;;  %2125 = vmatprep.subr.msk.bf16.mxu0 %vm1346_vm2, %v2743_v55  ;;  %v1269_v51 = vmax.f32 %v1083_v2, 0.0 }
 0x228   :  { %v1272_v50 = vmax.f32 %v1094_v46, 0.0  ;;  %v1405_v46 = vsel %vm1346_vm2, %v2765_v22, 0 }
 0x229   :  { %v1270_v54 = vmax.f32 %v1086_v48, 0.0 }
 0x22a   :  { %v2786_v56 = vpack.c.bf16 %v1272_v50, %v1271_v49 }
 0x22b   :  { %v2788_v57 = vpack.c.bf16 %v1270_v54, %v1269_v51  ;;  %v2054_v58 = vpop.f32.mrb[64].mxu1 }
 0x22c   :  { %v1107_v53 = vadd.f32 %v2054_v58, %v2674_v7  ;;  %v1098_v59 = vpop.f32.mrb[65].mxu1 }
 0x22d   :  { %v1099_v21 = vadd.f32 %v2674_v7, %v1098_v59  ;;  %v2055_v45 = vpop.f32.mrb[66].mxu1 }
 0x22e   :  { %v1110_v55 = vadd.f32 %v2055_v45, %v2674_v7  ;;  %v1101_v60 = vpop.f32.mrb[67].mxu1  ;;  %1866 = vmatpush3.bf16.xpose.msra.mxu0 %v1372_v42  ;;  %v1275_v38 = vmax.f32 %v1107_v53, 0.0 }
 0x22f   :  { %v1102_v10 = vadd.f32 %v2674_v7, %v1101_v60  ;;  %2084 = vmatprep.subr.bf16.mxu0 %v2196_v6  ;;  %v1273_v35 = vmax.f32 %v1099_v21, 0.0  ;;  %v1408_v60 = vsel %vm1346_vm2, %v2763_v19, 0 }
 0x230   :  { %v1276_v61 = vmax.f32 %v1110_v55, 0.0 }
 0x231   :  { %v1274_v4 = vmax.f32 %v1102_v10, 0.0 }
 0x232   :  { %v1331_v63 = vpack.c.bf16 %v1276_v61, %v1275_v38 }
 0x233   :  { %v1330_v5 = vpack.c.bf16 %v1274_v4, %v1273_v35  ;;  %v2058_v20 = vpop.f32.mrb[68].mxu1 }
 0x234   :  { %v1123_v8 = vadd.f32 %v2058_v20, %v2674_v7  ;;  %v1114_v9 = vpop.f32.mrb[69].mxu1 }
 0x235   :  { %2126 = vmatprep.subr.msk.bf16.mxu1 %vm1346_vm2, %v1330_v5  ;;  %v1115_v11 = vadd.f32 %v2674_v7, %v1114_v9  ;;  %v2059_v12 = vpop.f32.mrb[70].mxu1  ;;  %1868 = vmatmul.mubr.msk.bf16.vlgmr.msra.gmra.mrb[64].mxu0 %vm1346_vm2, %v2683_v0 }
 0x236   :  { %1870 = vmatpush3.bf16.xpose.msra.mxu1 %v1399_v52  ;;  %v1126_v13 = vadd.f32 %v2059_v12, %v2674_v7  ;;  %v1117_v14 = vpop.f32.mrb[71].mxu1  ;;  %2100 = vmatprep.mubr.msk.bf16.mxu0 %vm2197_vm3, %v2196_v6  ;;  %v1279_v16 = vmax.f32 %v1123_v8, 0.0 }
 0x237   :  { %2127 = vmatprep.subr.msk.bf16.mxu1 %vm1346_vm2, %v1331_v63  ;;  %v1118_v15 = vadd.f32 %v2674_v7, %v1117_v14  ;;  %v1277_v1 = vmax.f32 %v1115_v11, 0.0 }
 0x238   :  { %v1280_v17 = vmax.f32 %v1126_v13, 0.0  ;;  %v1411_v13 = vsel %vm1346_vm2, %v2776_v39, 0 }
 0x239   :  { %v1278_v18 = vmax.f32 %v1118_v15, 0.0 }
 0x23a   :  { %v1333_v23 = vpack.c.bf16 %v1280_v17, %v1279_v16 }
 0x23b   :  { %v1332_v3 = vpack.c.bf16 %v1278_v18, %v1277_v1  ;;  %v2062_v36 = vpop.f32.mrb[72].mxu1 }
 0x23c   :  { %v1139_v24 = vadd.f32 %v2062_v36, %v2674_v7  ;;  %v1130_v25 = vpop.f32.mrb[73].mxu1 }
 0x23d   :  { %v1131_v27 = vadd.f32 %v2674_v7, %v1130_v25  ;;  %v2063_v28 = vpop.f32.mrb[74].mxu1 }
 0x23e   :  { %1872 = vmatpush3.bf16.xpose.msra.mxu1 %v1402_v26  ;;  %v1142_v29 = vadd.f32 %v2063_v28, %v2674_v7  ;;  %v1133_v30 = vpop.f32.mrb[75].mxu1  ;;  %v1283_v32 = vmax.f32 %v1139_v24, 0.0 }
 0x23f   :  { %2128 = vmatprep.subr.msk.bf16.mxu1 %vm1346_vm2, %v1332_v3  ;;  %v1134_v31 = vadd.f32 %v2674_v7, %v1133_v30  ;;  %v1281_v40 = vmax.f32 %v1131_v27, 0.0 }
 0x240   :  { %v1284_v33 = vmax.f32 %v1142_v29, 0.0  ;;  %v1414_v29 = vsel %vm1346_vm2, %v2774_v37, 0 }
 0x241   :  { %v1282_v41 = vmax.f32 %v1134_v31, 0.0 }
 0x242   :  { %v1335_v34 = vpack.c.bf16 %v1284_v33, %v1283_v32 }
 0x243   :  { %v1334_v2 = vpack.c.bf16 %v1282_v41, %v1281_v40  ;;  %v2066_v43 = vpop.f32.mrb[76].mxu1 }
 0x244   :  { %v1155_v62 = vadd.f32 %v2066_v43, %v2674_v7  ;;  %v1146_v44 = vpop.f32.mrb[77].mxu1 }
 0x245   :  { %v1147_v47 = vadd.f32 %v2674_v7, %v1146_v44  ;;  %v2067_v48 = vpop.f32.mrb[78].mxu1 }
 0x246   :  { %1874 = vmatpush3.bf16.xpose.msra.mxu1 %v1405_v46  ;;  %v1158_v49 = vadd.f32 %v2067_v48, %v2674_v7  ;;  %v1149_v50 = vpop.f32.mrb[79].mxu1  ;;  %v1287_v54 = vmax.f32 %v1155_v62, 0.0 }
 0x247   :  { %2129 = vmatprep.subr.msk.bf16.mxu1 %vm1346_vm2, %v1333_v23  ;;  %v1150_v51 = vadd.f32 %v2674_v7, %v1149_v50  ;;  %v1285_v53 = vmax.f32 %v1147_v47, 0.0 }
 0x248   :  { %v1288_v58 = vmax.f32 %v1158_v49, 0.0  ;;  %v1417_v49 = vsel %vm1346_vm2, %v2788_v57, 0 }
 0x249   :  { %v1286_v59 = vmax.f32 %v1150_v51, 0.0 }
 0x24a   :  { %v2822_v21 = vpack.c.bf16 %v1288_v58, %v1287_v54 }
 0x24b   :  { %v1336_v45 = vpack.c.bf16 %v1286_v59, %v1285_v53  ;;  %v2070_v42 = vpop.f32.mrb[80].mxu1 }
 0x24c   :  { %v1171_v22 = vadd.f32 %v2070_v42, %v2674_v7  ;;  %v1162_v55 = vpop.f32.mrb[81].mxu1 }
 0x24d   :  { %v1163_v10 = vadd.f32 %v2674_v7, %v1162_v55  ;;  %v2071_v38 = vpop.f32.mrb[82].mxu1 }
 0x24e   :  { %1876 = vmatpush3.bf16.xpose.msra.mxu1 %v1408_v60  ;;  %v1174_v61 = vadd.f32 %v2071_v38, %v2674_v7  ;;  %v1165_v35 = vpop.f32.mrb[83].mxu1  ;;  %v1291_v63 = vmax.f32 %v1171_v22, 0.0 }
 0x24f   :  { %2130 = vmatprep.subr.msk.bf16.mxu1 %vm1346_vm2, %v1334_v2  ;;  %v1166_v4 = vadd.f32 %v2674_v7, %v1165_v35  ;;  %v1289_v20 = vmax.f32 %v1163_v10, 0.0  ;;  %v1420_v10 = vsel %vm1346_vm2, %v2786_v56, 0  ;;  %v1593_v35 = vstv %s2895_s6  ;;  %s2199_s6 = smov [#allocation3]  }
 0x250   :  { %v1292_v5 = vmax.f32 %v1174_v61, 0.0  ;;  %s1685_s1 = sshll.u32 %s2199_s6, 4  ;;  %s1686_s1 = int_to_ptr.vmem [resolvable:$true] %s1685_s1 }
 0x251   :  { %v1290_v8 = vmax.f32 %v1166_v4, 0.0  ;;  %s2172_s3 = scalar_lea.vmem %s1686_s1, 80  ;;  %s2176_s24 = scalar_lea.vmem %s1686_s1, 96 }
 0x252   :  { %v1339_v9 = vpack.c.bf16 %v1292_v5, %v1291_v63  ;;  %p2173_p0 = scmp.ne.s32.totalorder %s1686_s1, %s2172_s3  ;;  %p2177_p1 = scmp.lt.s32.totalorder %s1686_s1, %s1686_s1 }
 0x253   :  { %v1338_v52 = vpack.c.bf16 %v1290_v8, %v1289_v20  ;;  %v2074_v11 = vpop.f32.mrb[84].mxu1  ;;  %p2178_p2 = scmp.lt.s32.totalorder %s2176_s24, %s2172_s3 }
 0x254   :  { %v1187_v19 = vadd.f32 %v2074_v11, %v2674_v7  ;;  %v1178_v12 = vpop.f32.mrb[85].mxu1  ;;  %v1450_v30 = vsel %vm1346_vm2, %v1339_v9, 0 }
 0x255   :  { %v1447_v14 = vsel %vm1346_vm2, %v1338_v52, 0  ;;  %v1179_v15 = vadd.f32 %v2674_v7, %v1178_v12  ;;  %v2075_v16 = vpop.f32.mrb[86].mxu1  ;;  %p2179_p3 = por %p2178_p2, %p2177_p1 }
 0x256   :  { %1878 = vmatpush3.bf16.xpose.msra.mxu1 %v1411_v13  ;;  %2085 = vmatpush3.bf16.xpose.msra.mxu0 %v1447_v14  ;;  %v1295_v17 = vmax.f32 %v1187_v19, 0.0  ;;  %v1190_v1 = vadd.f32 %v2075_v16, %v2674_v7  ;;  %v1181_v18 = vpop.f32.mrb[87].mxu1 }
 0x257   :  { %2131 = vmatprep.subr.msk.bf16.mxu1 %vm1346_vm2, %v1335_v34  ;;  %v1293_v23 = vmax.f32 %v1179_v15, 0.0  ;;  %2086 = vmatprep.subr.bf16.mxu0 %v2196_v6  ;;  %v1182_v3 = vadd.f32 %v2674_v7, %v1181_v18  ;;  %p2180_p4 = pnand %p2179_p3, %p2173_p0 }
 0x258   :  { %v1296_v36 = vmax.f32 %v1190_v1, 0.0 }
 0x259   :  { %v1294_v39 = vmax.f32 %v1182_v3, 0.0 }
 0x25a   :  { %v1341_v24 = vpack.c.bf16 %v1296_v36, %v1295_v17 }
 0x25b   :  { %v1340_v25 = vpack.c.bf16 %v1294_v39, %v1293_v23  ;;  %v2078_v26 = vpop.f32.mrb[88].mxu1 }
 0x25c   :  { %v1203_v27 = vadd.f32 %v2078_v26, %v2674_v7  ;;  %v1194_v28 = vpop.f32.mrb[89].mxu1  ;;  %v1456_v38 = vsel %vm1346_vm2, %v1341_v24, 0 }
 0x25d   :  { %v1195_v31 = vadd.f32 %v2674_v7, %v1194_v28  ;;  %v2079_v32 = vpop.f32.mrb[90].mxu1  ;;  %v1453_v50 = vsel %vm1346_vm2, %v1340_v25, 0  ;;  %v2198_v28 = vmov 1966171168  }
 0x25e   :  { %1880 = vmatpush3.bf16.xpose.msra.mxu1 %v1414_v29  ;;  %2087 = vmatpush3.bf16.xpose.msra.mxu0 %v1450_v30  ;;  %v1299_v33 = vmax.f32 %v1203_v27, 0.0  ;;  %v1206_v40 = vadd.f32 %v2079_v32, %v2674_v7  ;;  %v1197_v41 = vpop.f32.mrb[91].mxu1  ;;  %v1637_v29 = vunpack.c.l.s4 %v2198_v28  ;;  %v1639_v30 = vlaneseq }
 0x25f   :  { %2132 = vmatprep.subr.msk.bf16.mxu1 %vm1346_vm2, %v1336_v45  ;;  %2088 = vmatprep.subr.bf16.mxu0 %v2196_v6  ;;  %v1297_v34 = vmax.f32 %v1195_v31, 0.0  ;;  %v1198_v2 = vadd.f32 %v2674_v7, %v1197_v41 }
 0x260   :  { %v1300_v43 = vmax.f32 %v1206_v40, 0.0  ;;  %v1638_v31 = vunpack.c.0.s8 %v1637_v29  ;;  %v1640_v32 = vshrl.u32 %v1639_v30, 7  ;;  %vm1676_vm4 = vcmp.lt.s32.totalorder %v1639_v30, 640 }
 0x261   :  { %v1298_v37 = vmax.f32 %v1198_v2, 0.0 }
 0x262   :  { %v1343_v62 = vpack.c.bf16 %v1300_v43, %v1299_v33  ;;  %v1641_v40 = vsub.s32 %v1638_v31, %v1640_v32 }
 0x263   :  { %v1342_v44 = vpack.c.bf16 %v1298_v37, %v1297_v34  ;;  %v2082_v46 = vpop.f32.mrb[92].mxu1 }
 0x264   :  { %v1219_v47 = vadd.f32 %v2082_v46, %v2674_v7  ;;  %v1210_v48 = vpop.f32.mrb[93].mxu1 }
 0x265   :  { %v1211_v51 = vadd.f32 %v2674_v7, %v1210_v48  ;;  %v2083_v54 = vpop.f32.mrb[94].mxu1 }
 0x266   :  { %1882 = vmatpush3.bf16.xpose.msra.mxu1 %v1417_v49  ;;  %2089 = vmatpush3.bf16.xpose.msra.mxu0 %v1453_v50  ;;  %v1303_v58 = vmax.f32 %v1219_v47, 0.0  ;;  %v1222_v53 = vadd.f32 %v2083_v54, %v2674_v7  ;;  %v1213_v59 = vpop.f32.mrb[95].mxu1 }
 0x267   :  { %2133 = vmatprep.subr.msk.bf16.mxu1 %vm1346_vm2, %v2822_v21  ;;  %2090 = vmatprep.subr.bf16.mxu0 %v2196_v6  ;;  %v1301_v45 = vmax.f32 %v1211_v51, 0.0  ;;  %v1214_v42 = vadd.f32 %v2674_v7, %v1213_v59  ;;  %v1459_v21 = vsel %vm1346_vm2, %v1342_v44, 0  ;;  %v1462_v7 = vsel %vm1346_vm2, %v1343_v62, 0 }
 0x268   :  { %v1304_v57 = vmax.f32 %v1222_v53, 0.0 }
 0x269   :  { %v1302_v22 = vmax.f32 %v1214_v42, 0.0 }
 0x26a   :  { %v1345_v55 = vpack.c.bf16 %v1304_v57, %v1303_v58 }
 0x26b   :  { %v1344_v60 = vpack.c.bf16 %v1302_v22, %v1301_v45 }
 0x26c   :  { %v1468_v61 = vsel %vm1346_vm2, %v1345_v55, 0 }
 0x26d   :  { %v1465_v56 = vsel %vm1346_vm2, %v1344_v60, 0 }
 0x26e   :  { %1884 = vmatpush3.bf16.xpose.msra.mxu1 %v1420_v10  ;;  %2091 = vmatpush3.bf16.xpose.msra.mxu0 %v1456_v38 }
 0x26f   :  { %2092 = vmatprep.subr.bf16.mxu0 %v2196_v6 }
 0x275   :  { %1886 = vmatmul.mubr.msk.bf16.vlgmr.msra.gmra.mrb[96].mxu1 %vm1346_vm2, %v2683_v0 }
 0x276   :  { %2093 = vmatpush3.bf16.xpose.msra.mxu0 %v1459_v21 }
 0x277   :  { %2094 = vmatprep.subr.bf16.mxu0 %v2196_v6 }
 0x27e   :  { %2095 = vmatpush3.bf16.xpose.msra.mxu0 %v1462_v7 }
 0x27f   :  { %2096 = vmatprep.subr.bf16.mxu0 %v2196_v6 }
 0x286   :  { %2097 = vmatpush3.bf16.xpose.msra.mxu0 %v1465_v56 }
 0x287   :  { %2098 = vmatprep.subr.bf16.mxu0 %v2196_v6 }
 0x28e   :  { %2099 = vmatpush3.bf16.xpose.msra.mxu0 %v1468_v61 }
 0x295   :  { %2101 = vmatmul.mubr.msk.bf16.vlgmr.msra.gmra.mrb[68].mxu0 %vm1346_vm2, %v2683_v0 }
 0x308   :  { %v1504_v4 = vpop.f32.mrb[64].mxu0 }
 0x309   :  { %v1594_v63 = vadd.f32 %v1593_v35, %v1504_v4  ;;  %v1506_v5 = vpop.f32.mrb[65].mxu0 }
 0x30a   :  { %v1595_v20 = vadd.f32 %v1593_v35, %v1506_v5  ;;  %v1508_v8 = vpop.f32.mrb[66].mxu0 }
 0x30b   :  { %v1752_v9 = vmul.f32 -1.442695, %v1594_v63  ;;  %v1509_v52 = vpop.f32.mrb[67].mxu0 }
 0x30c   :  { %v1753_v11 = vmul.f32 -1.442695, %v1595_v20 }
 0x30d   :  { %2152 = vpow2.f32 %v1752_v9 }
 0x30e   :  { %2154 = vpow2.f32 %v1753_v11 }
 0x317   :  { %v2153_v6 = vpop.eup %2152 }
 0x318   :  { %v2155_v19 = vpop.eup %2154  ;;  %v1614_v12 = vadd.f32 1.0, %v2153_v6 }
 0x319   :  { %v1615_v13 = vadd.f32 1.0, %v2155_v19 }
 0x31a   :  { %2156 = vrcp.f32 %v1614_v12 }
 0x31b   :  { %2158 = vrcp.f32 %v1615_v13 }
 0x324   :  { %v2157_v0 = vpop.eup %2156 }
 0x325   :  { %v2159_v14 = vpop.eup %2158 }
 0x326   :  { %v1634_v15 = vcombine.low %v2157_v0, %v2159_v14 }
 0x328   :  { %v1642_v43 = vrot.slane %v1634_v15, %v1641_v40 }
 0x348   :  { %v1545_v16 = vpop.f32.mrb[96].mxu1 }
 0x349   :  { %v1596_v17 = vadd.f32 %v1593_v35, %v1545_v16  ;;  %v1547_v1 = vpop.f32.mrb[97].mxu1 }
 0x34a   :  { %v1597_v18 = vadd.f32 %v1593_v35, %v1547_v1  ;;  %v1549_v23 = vpop.f32.mrb[98].mxu1 }
 0x34b   :  { %v1754_v3 = vmul.f32 -1.442695, %v1596_v17  ;;  %v1550_v36 = vpop.f32.mrb[99].mxu1 }
 0x34c   :  { %v1755_v39 = vmul.f32 -1.442695, %v1597_v18 }
 0x34d   :  { %2160 = vpow2.f32 %v1754_v3 }
 0x34e   :  { %2162 = vpow2.f32 %v1755_v39 }
 0x357   :  { %v2161_v24 = vpop.eup %2160 }
 0x358   :  { %v2163_v25 = vpop.eup %2162  ;;  %v1616_v26 = vadd.f32 1.0, %v2161_v24 }
 0x359   :  { %v1617_v27 = vadd.f32 1.0, %v2163_v25 }
 0x35a   :  { %2164 = vrcp.f32 %v1616_v26 }
 0x35b   :  { %2166 = vrcp.f32 %v1617_v27 }
 0x364   :  { %v2165_v33 = vpop.eup %2164 }
 0x365   :  { %v2167_v41 = vpop.eup %2166 }
 0x366   :  { %v1635_v34 = vcombine.low %v2165_v33, %v2167_v41 }
 0x368   :  { %v1586_v2 = vpop.f32.mrb[68].mxu0  ;;  %v1649_v37 = vrot.slane %v1635_v34, %v1641_v40 }
 0x369   :  { %v1598_v62 = vadd.f32 %v1593_v35, %v1586_v2  ;;  %v2102_v44 = vpop.f32.mrb[69].mxu0 }
 0x36a   :  { %v1589_v46 = vpop.f32.mrb[70].mxu0  ;;  %v1657_v47 = vcombine.low %v1642_v43, %v1649_v37 }
 0x36b   :  { %v1756_v48 = vmul.f32 -1.442695, %v1598_v62  ;;  %v2103_v49 = vpop.f32.mrb[71].mxu0 }
 0x36c   :  { %v1664_v53 = vrot.slane %v1657_v47, %v1641_v40 }
 0x36d   :  { %2168 = vpow2.f32 %v1756_v48 }
 0x377   :  { %v2169_v50 = vpop.eup %2168 }
 0x378   :  { %v1618_v51 = vadd.f32 1.0, %v2169_v50 }
 0x37a   :  { %2170 = vrcp.f32 %v1618_v51 }
 0x384   :  { %v2171_v54 = vpop.eup %2170 }
 0x385   :  { %v1656_v58 = vrot.slane %v2171_v54, %v1641_v40 }
 0x387   :  { %v1671_v59 = vrot.slane %v1656_v58, %v1641_v40 }
 0x389   :  { %v1672_v45 = vcombine.low %v1664_v53, %v1671_v59 }
 0x38b   :  { %1678 = vst.msk [vmem:[#allocation3] sm:$0x1f] %vm1676_vm4, %v1672_v45 }
 0x38c   :  { %2183 = shalt.err (!%p2180_p4)
}
 0x38d   :  { %s2184_s27 = scalar_lea.hbm %s2896_s7, 80 }
 0x38e   :  { %p2185_p5 = scmp.ne.s32.totalorder %s2896_s7, %s2184_s27  ;;  %p2188_p6 = scmp.lt.u32.totalorder %s2184_s27, %s2896_s7 }
 0x390   :  { %p2190_p7 = pnand %p2188_p6, %p2185_p5 }
 0x392   :  { %2193 = shalt.err (!%p2190_p7)
}
 0x393   :  { %1688 = dma.vmem_to_hbm [thread:$0]  %s1686_s1, 80, %s2896_s7, [#allocation4]  }
 0x394   :  { %2194 = dma.done.wait [#allocation4], 80  }
 0x395   :  { %2195 = vsyncadd [#allocation4], 4294967216 }
 0x396   :  { %1692 = vsyncpa [#allocation4], 1 }

</bundles_post_ra>
